<compile_context>
chip_gen: v5e
topology: v5e:2x2
jax: 0.10.0
libtpu: 0.0.40
codegen_flags: <defaults>
</compile_context>

<pallas_src>
import functools

import numpy as np
import jax
import jax.numpy as jnp
from jax.experimental import pallas as pl
from jax.experimental.pallas import tpu as pltpu

LANE = 128   # TPU vreg lane width
H0 = 28      # input spatial size (linear1's 250 = 10*5*5 forces 28x28 inputs)
H1 = 26      # conv1 output spatial size
P1 = 13      # pool1 output spatial size
H2 = 11      # conv2 output spatial size
P2 = 5       # pool2 output spatial size
C1 = 3       # conv1 out channels
C2 = 10      # conv2 out channels
F1, F2, F3 = 120, 70, 10          # linear layer widths

ROWS0 = 32   # per-sample row stride of the zero-padded input / conv1 stage
ROWS1 = 16   # per-sample row stride after pool1 (13 valid rows + 3 junk)
ROWS2 = 8    # per-sample row stride after pool2 (5 valid rows + 3 junk)


# ----------------------------------------------------------------------------
# Fused kernel (fully batched over the tb samples of the grid step)
# ----------------------------------------------------------------------------
def image_model_kernel(x_ref, t1_ref, cb1_ref, t2_ref, cb2_ref, w1_ref,
                       lb1_ref, w2_ref, lb2_ref, w3_ref, lb3_ref,
                       out_ref, wq1_ref, p1_ref, wq2_ref, p2_ref):
    tb = out_ref.shape[0]
    m1 = tb * ROWS0 - 2     # conv1 rows computed (covers every valid row)
    m2 = tb * ROWS1 - 2     # conv2 rows computed

    # ---- conv1 as batch-wide banded matmuls.  Row j of the result is the
    #      conv output row for (sample j // 32, height j % 32); even/odd
    #      output-width columns live in lanes [0,128)/[128,256), which folds
    #      the width half of pool1 into the weights. ----
    h1 = jnp.dot(x_ref[pl.ds(0, m1), :], t1_ref[0],
                 preferred_element_type=jnp.float32)
    for ki in range(1, 3):
        h1 = h1 + jnp.dot(x_ref[pl.ds(ki, m1), :], t1_ref[ki],
                          preferred_element_type=jnp.float32)
    wq1_ref[pl.ds(0, m1), :] = jnp.maximum(h1[:, :LANE], h1[:, LANE:])
    wq1_ref[pl.ds(m1, 2), :] = jnp.zeros((2, LANE), jnp.float32)  # init tail

    # ---- pool1 height half (+ conv1 bias + ReLU; both commute with max). ----
    p1 = jnp.maximum(wq1_ref[pl.ds(0, tb * ROWS1, 2), :],
                     wq1_ref[pl.ds(1, tb * ROWS1, 2), :])
    p1_ref[...] = jnp.maximum(p1 + cb1_ref[...], 0.0)

    # ---- conv2: same batched banded-matmul trick on the pooled activations
    #      (input lanes = c1*13 + x, output lanes = c2*5 + s). ----
    h2 = jnp.dot(p1_ref[pl.ds(0, m2), :], t2_ref[0],
                 preferred_element_type=jnp.float32)
    for ki in range(1, 3):
        h2 = h2 + jnp.dot(p1_ref[pl.ds(ki, m2), :], t2_ref[ki],
                          preferred_element_type=jnp.float32)
    wq2_ref[pl.ds(0, m2), :] = jnp.maximum(h2[:, :LANE], h2[:, LANE:])
    wq2_ref[pl.ds(m2, 2), :] = jnp.zeros((2, LANE), jnp.float32)  # init tail

    # ---- pool2 height half (+ conv2 bias + ReLU). ----
    p2 = jnp.maximum(wq2_ref[pl.ds(0, tb * ROWS2, 2), :],
                     wq2_ref[pl.ds(1, tb * ROWS2, 2), :])
    p2_ref[...] = jnp.maximum(p2 + cb2_ref[...], 0.0)

    # ---- linear1 with the torch (C,H,W) flatten folded into the packed
    #      weight: gather pooled height-row r of every sample (stride-8
    #      sublane read) and contract against w1[r]. ----
    z1 = jnp.dot(p2_ref[pl.ds(0, tb, ROWS2), :], w1_ref[0],
                 preferred_element_type=jnp.float32)
    for r in range(1, P2):
        z1 = z1 + jnp.dot(p2_ref[pl.ds(r, tb, ROWS2), :], w1_ref[r],
                          preferred_element_type=jnp.float32)
    z1 = jnp.maximum(z1 + lb1_ref[...], 0.0)

    # ---- MLP tail (lane-dense, zero padded to 128). ----
    a2 = jnp.maximum(
        jnp.dot(z1, w2_ref[...], preferred_element_type=jnp.float32)
        + lb2_ref[...], 0.0)
    out_ref[...] = (
        jnp.dot(a2, w3_ref[...], preferred_element_type=jnp.float32)
        + lb3_ref[...])


# ----------------------------------------------------------------------------
# One-time host-side weight packing (outside the jitted forward)
# ----------------------------------------------------------------------------
def prepare_params(p):
    cw1 = np.asarray(p["cw1"], np.float32)   # (3,1,3,3)  OIHW
    cb1 = np.asarray(p["cb1"], np.float32)   # (3,)
    cw2 = np.asarray(p["cw2"], np.float32)   # (10,3,3,3)
    cb2 = np.asarray(p["cb2"], np.float32)   # (10,)
    W1 = np.asarray(p["W1"], np.float32)     # (120,250)
    b1 = np.asarray(p["b1"], np.float32)
    W2 = np.asarray(p["W2"], np.float32)     # (70,120)
    b2 = np.asarray(p["b2"], np.float32)
    W3 = np.asarray(p["W3"], np.float32)     # (10,70)
    b3 = np.asarray(p["b3"], np.float32)

    # conv1 banded matrices.  Output lane = c1*13 + s (pooled width); even conv
    # width (2s) in lanes [0,128), odd (2s+1) in lanes [128,256).
    t1 = np.zeros((3, H0, 2 * LANE), np.float32)
    for c in range(C1):
        for ki in range(3):
            for kj in range(3):
                for s in range(P1):
                    t1[ki, 2 * s + kj, c * P1 + s] = cw1[c, 0, ki, kj]
                    t1[ki, 2 * s + 1 + kj, LANE + c * P1 + s] = cw1[c, 0, ki, kj]
    cb1row = np.zeros((1, LANE), np.float32)
    for c in range(C1):
        cb1row[0, c * P1:(c + 1) * P1] = cb1[c]

    # conv2 banded matrices.  Input lane = c1*13 + x, output lane = c2*5 + s.
    t2 = np.zeros((3, LANE, 2 * LANE), np.float32)
    for c2 in range(C2):
        for c1 in range(C1):
            for ki in range(3):
                for kj in range(3):
                    for s in range(P2):
                        t2[ki, c1 * P1 + 2 * s + kj, c2 * P2 + s] = cw2[c2, c1, ki, kj]
                        t2[ki, c1 * P1 + 2 * s + 1 + kj, LANE + c2 * P2 + s] = cw2[c2, c1, ki, kj]
    cb2row = np.zeros((1, LANE), np.float32)
    for c2 in range(C2):
        cb2row[0, c2 * P2:(c2 + 1) * P2] = cb2[c2]

    # linear1 with the torch flatten folded in: w1[r, c2*5+s, k] = W1[k, c2*25+r*5+s]
    w1eff = np.zeros((P2, LANE, LANE), np.float32)
    for c2 in range(C2):
        for r in range(P2):
            for s in range(P2):
                w1eff[r, c2 * P2 + s, :F1] = W1[:, c2 * 25 + r * P2 + s]
    lb1row = np.zeros((1, LANE), np.float32); lb1row[0, :F1] = b1

    w2p = np.zeros((LANE, LANE), np.float32); w2p[:F1, :F2] = W2.T
    lb2row = np.zeros((1, LANE), np.float32); lb2row[0, :F2] = b2
    w3p = np.zeros((LANE, LANE), np.float32); w3p[:F2, :F3] = W3.T
    lb3row = np.zeros((1, LANE), np.float32); lb3row[0, :F3] = b3

    packed = dict(t1=t1, cb1=cb1row, t2=t2, cb2=cb2row, w1=w1eff, lb1=lb1row,
                  w2=w2p, lb2=lb2row, w3=w3p, lb3=lb3row)
    return {k: jnp.asarray(v) for k, v in packed.items()}


# ----------------------------------------------------------------------------
# Forward wrapper (single fused pallas_call, batch-block grid)
# ----------------------------------------------------------------------------
@functools.partial(jax.jit, static_argnames=("block_b",))
def image_model_forward(x, packed, block_b=8):
    B = x.shape[0]
    assert x.shape[1:] == (1, H0, H0)
    tb = min(block_b, B)
    bp = ((B + tb - 1) // tb) * tb

    # Zero-pad every sample's height to ROWS0 rows and lay the batch along the
    # sublane axis -> one 2D slab, so the convs run as batch-wide matmuls.
    x2 = x.reshape(B, H0, H0).astype(jnp.float32)
    x2 = jnp.pad(x2, ((0, bp - B), (0, ROWS0 - H0), (0, 0)))
    x2 = x2.reshape(bp * ROWS0, H0)

    out = pl.pallas_call(
        image_model_kernel,
        out_shape=jax.ShapeDtypeStruct((bp, LANE), jnp.float32),
        grid=(bp // tb,),
        in_specs=[
            pl.BlockSpec((tb * ROWS0, H0), lambda i: (i, 0)),        # x slab
            pl.BlockSpec((3, H0, 2 * LANE), lambda i: (0, 0, 0)),    # t1
            pl.BlockSpec((1, LANE), lambda i: (0, 0)),               # cb1
            pl.BlockSpec((3, LANE, 2 * LANE), lambda i: (0, 0, 0)),  # t2
            pl.BlockSpec((1, LANE), lambda i: (0, 0)),               # cb2
            pl.BlockSpec((P2, LANE, LANE), lambda i: (0, 0, 0)),     # w1 (flatten folded)
            pl.BlockSpec((1, LANE), lambda i: (0, 0)),               # lb1
            pl.BlockSpec((LANE, LANE), lambda i: (0, 0)),            # w2
            pl.BlockSpec((1, LANE), lambda i: (0, 0)),               # lb2
            pl.BlockSpec((LANE, LANE), lambda i: (0, 0)),            # w3
            pl.BlockSpec((1, LANE), lambda i: (0, 0)),               # lb3
        ],
        out_specs=pl.BlockSpec((tb, LANE), lambda i: (i, 0)),
        scratch_shapes=[
            pltpu.VMEM((tb * ROWS0, LANE), jnp.float32),  # W-pooled conv1 pre-act
            pltpu.VMEM((tb * ROWS1, LANE), jnp.float32),  # pool1 output
            pltpu.VMEM((tb * ROWS1, LANE), jnp.float32),  # W-pooled conv2 pre-act
            pltpu.VMEM((tb * ROWS2, LANE), jnp.float32),  # pool2 output
        ],
        compiler_params=pltpu.CompilerParams(
            dimension_semantics=("parallel",)),           # v7x: batch over 2 TCs
    )(x2, packed["t1"], packed["cb1"], packed["t2"], packed["cb2"],
      packed["w1"], packed["lb1"], packed["w2"], packed["lb2"],
      packed["w3"], packed["lb3"])
    return out[:B, :F3]


# ----------------------------------------------------------------------------
# Pure-JAX reference + params
# ----------------------------------------------------------------------------
def reference_forward(x, p):
    def conv(y, w, b):
        y = jax.lax.conv_general_dilated(
            y, w, window_strides=(1, 1), padding="VALID",
            dimension_numbers=("NCHW", "OIHW", "NCHW"))
        return y + b[None, :, None, None]

    def pool(y):
        return jax.lax.reduce_window(y, -jnp.inf, jax.lax.max,
                                     (1, 1, 2, 2), (1, 1, 2, 2), "VALID")

    y = pool(jax.nn.relu(conv(x, p["cw1"], p["cb1"])))
    y = pool(jax.nn.relu(conv(y, p["cw2"], p["cb2"])))
    y = y.reshape(y.shape[0], -1)
    y = jax.nn.relu(y @ p["W1"].T + p["b1"])
    y = jax.nn.relu(y @ p["W2"].T + p["b2"])
    return y @ p["W3"].T + p["b3"]


def init_params(key):
    ks = jax.random.split(key, 10)
    s = 0.1
    return {
        "cw1": s * jax.random.normal(ks[0], (3, 1, 3, 3), jnp.float32),
        "cb1": s * jax.random.normal(ks[1], (3,), jnp.float32),
        "cw2": s * jax.random.normal(ks[2], (10, 3, 3, 3), jnp.float32),
        "cb2": s * jax.random.normal(ks[3], (10,), jnp.float32),
        "W1": s * jax.random.normal(ks[4], (120, 250), jnp.float32),
        "b1": s * jax.random.normal(ks[5], (120,), jnp.float32),
        "W2": s * jax.random.normal(ks[6], (70, 120), jnp.float32),
        "b2": s * jax.random.normal(ks[7], (70,), jnp.float32),
        "W3": s * jax.random.normal(ks[8], (10, 70), jnp.float32),
        "b3": s * jax.random.normal(ks[9], (10,), jnp.float32),
    }


if __name__ == "__main__":
    key = jax.random.PRNGKey(0)
    kx, kp = jax.random.split(key)
    # Input spatial size 28x28 is dictated by linear1 (in_features=250 = 10*5*5).
    x = jax.random.normal(kx, (2, 1, 28, 28), jnp.float32)
    params = init_params(kp)
    packed = prepare_params(params)          # one-time weight packing, outside jit

    out = image_model_forward(x, packed)
    out = jax.block_until_ready(out)
    assert out.shape == (2, 10) and out.dtype == jnp.float32

    ref = reference_forward(x, params)
    assert jnp.allclose(out, ref, rtol=1e-2, atol=1e-2), (out, ref)

    print("KERNEL_OK")
</pallas_src>

<mosaic_0001>
module attributes {stable_mosaic.version = 11 : i64} {
  func.func @image_model_kernel(%arg0: i32, %arg1: memref<64x28xf32, #tpu.memory_space<vmem>>, %arg2: memref<3x28x256xf32, #tpu.memory_space<vmem>>, %arg3: memref<1x128xf32, #tpu.memory_space<vmem>>, %arg4: memref<3x128x256xf32, #tpu.memory_space<vmem>>, %arg5: memref<1x128xf32, #tpu.memory_space<vmem>>, %arg6: memref<5x128x128xf32, #tpu.memory_space<vmem>>, %arg7: memref<1x128xf32, #tpu.memory_space<vmem>>, %arg8: memref<128x128xf32, #tpu.memory_space<vmem>>, %arg9: memref<1x128xf32, #tpu.memory_space<vmem>>, %arg10: memref<128x128xf32, #tpu.memory_space<vmem>>, %arg11: memref<1x128xf32, #tpu.memory_space<vmem>>, %arg12: memref<2x128xf32, #tpu.memory_space<vmem>>, %arg13: memref<64x128xf32, #tpu.memory_space<vmem>>, %arg14: memref<32x128xf32, #tpu.memory_space<vmem>>, %arg15: memref<32x128xf32, #tpu.memory_space<vmem>>, %arg16: memref<16x128xf32, #tpu.memory_space<vmem>>) attributes {dimension_semantics = [#tpu.dimension_semantics<parallel>], iteration_bounds = array<i64: 1>, scalar_prefetch = 0 : i64, scratch_operands = 4 : i64, tpu.core_type = #tpu.core_type<tc>, window_params = [{transform_indices = @transform_0, window_bounds = array<i64: 64, 28>}, {pipeline_mode = #tpu.pipeline_mode<synchronous>, transform_indices = @transform_1, window_bounds = array<i64: 3, 28, 256>}, {pipeline_mode = #tpu.pipeline_mode<synchronous>, transform_indices = @transform_2, window_bounds = array<i64: 1, 128>}, {pipeline_mode = #tpu.pipeline_mode<synchronous>, transform_indices = @transform_3, window_bounds = array<i64: 3, 128, 256>}, {pipeline_mode = #tpu.pipeline_mode<synchronous>, transform_indices = @transform_4, window_bounds = array<i64: 1, 128>}, {pipeline_mode = #tpu.pipeline_mode<synchronous>, transform_indices = @transform_5, window_bounds = array<i64: 5, 128, 128>}, {pipeline_mode = #tpu.pipeline_mode<synchronous>, transform_indices = @transform_6, window_bounds = array<i64: 1, 128>}, {pipeline_mode = #tpu.pipeline_mode<synchronous>, transform_indices = @transform_7, window_bounds = array<i64: 128, 128>}, {pipeline_mode = #tpu.pipeline_mode<synchronous>, transform_indices = @transform_8, window_bounds = array<i64: 1, 128>}, {pipeline_mode = #tpu.pipeline_mode<synchronous>, transform_indices = @transform_9, window_bounds = array<i64: 128, 128>}, {pipeline_mode = #tpu.pipeline_mode<synchronous>, transform_indices = @transform_10, window_bounds = array<i64: 1, 128>}, {transform_indices = @transform_11, window_bounds = array<i64: 2, 128>}]} {
    %c0 = arith.constant 0 : index
    %c0_0 = arith.constant 0 : index
    %0 = vector.load %arg1[%c0, %c0_0] : memref<64x28xf32, #tpu.memory_space<vmem>>, vector<62x28xf32>
    %c0_1 = arith.constant 0 : index
    %c0_2 = arith.constant 0 : index
    %c0_3 = arith.constant 0 : index
    %1 = vector.load %arg2[%c0_1, %c0_2, %c0_3] : memref<3x28x256xf32, #tpu.memory_space<vmem>>, vector<1x28x256xf32>
    %2 = vector.shape_cast %1 : vector<1x28x256xf32> to vector<28x256xf32>
    %cst = arith.constant dense<0.000000e+00> : vector<62x256xf32>
    %3 = tpu.matmul %0, %2, %cst {dimension_numbers = #tpu.dot_dimension_numbers<[1], [0], [0], [1], [0, 0, 1, 1], [], []>} : vector<62x28xf32>, vector<28x256xf32>, vector<62x256xf32> -> vector<62x256xf32>
    %c1 = arith.constant 1 : index
    %c0_4 = arith.constant 0 : index
    %4 = vector.load %arg1[%c1, %c0_4] : memref<64x28xf32, #tpu.memory_space<vmem>>, vector<62x28xf32>
    %c1_5 = arith.constant 1 : index
    %c0_6 = arith.constant 0 : index
    %c0_7 = arith.constant 0 : index
    %5 = vector.load %arg2[%c1_5, %c0_6, %c0_7] : memref<3x28x256xf32, #tpu.memory_space<vmem>>, vector<1x28x256xf32>
    %6 = vector.shape_cast %5 : vector<1x28x256xf32> to vector<28x256xf32>
    %cst_8 = arith.constant dense<0.000000e+00> : vector<62x256xf32>
    %7 = tpu.matmul %4, %6, %cst_8 {dimension_numbers = #tpu.dot_dimension_numbers<[1], [0], [0], [1], [0, 0, 1, 1], [], []>} : vector<62x28xf32>, vector<28x256xf32>, vector<62x256xf32> -> vector<62x256xf32>
    %8 = arith.addf %3, %7 : vector<62x256xf32>
    %c2 = arith.constant 2 : index
    %c0_9 = arith.constant 0 : index
    %9 = vector.load %arg1[%c2, %c0_9] : memref<64x28xf32, #tpu.memory_space<vmem>>, vector<62x28xf32>
    %c2_10 = arith.constant 2 : index
    %c0_11 = arith.constant 0 : index
    %c0_12 = arith.constant 0 : index
    %10 = vector.load %arg2[%c2_10, %c0_11, %c0_12] : memref<3x28x256xf32, #tpu.memory_space<vmem>>, vector<1x28x256xf32>
    %11 = vector.shape_cast %10 : vector<1x28x256xf32> to vector<28x256xf32>
    %cst_13 = arith.constant dense<0.000000e+00> : vector<62x256xf32>
    %12 = tpu.matmul %9, %11, %cst_13 {dimension_numbers = #tpu.dot_dimension_numbers<[1], [0], [0], [1], [0, 0, 1, 1], [], []>} : vector<62x28xf32>, vector<28x256xf32>, vector<62x256xf32> -> vector<62x256xf32>
    %13 = arith.addf %8, %12 : vector<62x256xf32>
    %14 = vector.extract_strided_slice %13 {offsets = [0, 0], sizes = [62, 128], strides = [1, 1]} : vector<62x256xf32> to vector<62x128xf32>
    %15 = vector.extract_strided_slice %13 {offsets = [0, 128], sizes = [62, 128], strides = [1, 1]} : vector<62x256xf32> to vector<62x128xf32>
    %16 = arith.maximumf %14, %15 : vector<62x128xf32>
    %c0_14 = arith.constant 0 : index
    %c0_15 = arith.constant 0 : index
    %17 = vector.load %arg13[%c0_14, %c0_15] : memref<64x128xf32, #tpu.memory_space<vmem>>, vector<62x128xf32>
    tpu.vector_store %arg13[%c0_14, %c0_15], %16 {strides = array<i32>} : memref<64x128xf32, #tpu.memory_space<vmem>>, vector<62x128xf32>,
    %cst_16 = arith.constant 0.000000e+00 : f32
    %18 = vector.broadcast %cst_16 : f32 to vector<2x128xf32>
    %c62 = arith.constant 62 : index
    %c0_17 = arith.constant 0 : index
    %19 = vector.load %arg13[%c62, %c0_17] : memref<64x128xf32, #tpu.memory_space<vmem>>, vector<2x128xf32>
    tpu.vector_store %arg13[%c62, %c0_17], %18 {strides = array<i32>} : memref<64x128xf32, #tpu.memory_space<vmem>>, vector<2x128xf32>,
    %c0_18 = arith.constant 0 : index
    %c0_19 = arith.constant 0 : index
    %20 = tpu.strided_load %arg13[%c0_18, %c0_19] {strides = array<i32: 2, 1>} : memref<64x128xf32, #tpu.memory_space<vmem>>, vector<32x128xf32>
    %c1_20 = arith.constant 1 : index
    %c0_21 = arith.constant 0 : index
    %21 = tpu.strided_load %arg13[%c1_20, %c0_21] {strides = array<i32: 2, 1>} : memref<64x128xf32, #tpu.memory_space<vmem>>, vector<32x128xf32>
    %22 = arith.maximumf %20, %21 : vector<32x128xf32>
    %c0_22 = arith.constant 0 : index
    %c0_23 = arith.constant 0 : index
    %23 = vector.load %arg3[%c0_22, %c0_23] : memref<1x128xf32, #tpu.memory_space<vmem>>, vector<1x128xf32>
    %24 = vector.broadcast %23 : vector<1x128xf32> to vector<32x128xf32>
    %25 = arith.addf %22, %24 : vector<32x128xf32>
    %cst_24 = arith.constant 0.000000e+00 : f32
    %26 = vector.broadcast %cst_24 : f32 to vector<32x128xf32>
    %27 = arith.maximumf %25, %26 : vector<32x128xf32>
    %c0_25 = arith.constant 0 : index
    %c0_26 = arith.constant 0 : index
    %28 = vector.load %arg14[%c0_25, %c0_26] : memref<32x128xf32, #tpu.memory_space<vmem>>, vector<32x128xf32>
    tpu.vector_store %arg14[%c0_25, %c0_26], %27 {strides = array<i32>} : memref<32x128xf32, #tpu.memory_space<vmem>>, vector<32x128xf32>,
    %c0_27 = arith.constant 0 : index
    %c0_28 = arith.constant 0 : index
    %29 = vector.load %arg14[%c0_27, %c0_28] : memref<32x128xf32, #tpu.memory_space<vmem>>, vector<30x128xf32>
    %c0_29 = arith.constant 0 : index
    %c0_30 = arith.constant 0 : index
    %c0_31 = arith.constant 0 : index
    %30 = vector.load %arg4[%c0_29, %c0_30, %c0_31] : memref<3x128x256xf32, #tpu.memory_space<vmem>>, vector<1x128x256xf32>
    %31 = vector.shape_cast %30 : vector<1x128x256xf32> to vector<128x256xf32>
    %cst_32 = arith.constant dense<0.000000e+00> : vector<30x256xf32>
    %32 = tpu.matmul %29, %31, %cst_32 {dimension_numbers = #tpu.dot_dimension_numbers<[1], [0], [0], [1], [0, 0, 1, 1], [], []>} : vector<30x128xf32>, vector<128x256xf32>, vector<30x256xf32> -> vector<30x256xf32>
    %c1_33 = arith.constant 1 : index
    %c0_34 = arith.constant 0 : index
    %33 = vector.load %arg14[%c1_33, %c0_34] : memref<32x128xf32, #tpu.memory_space<vmem>>, vector<30x128xf32>
    %c1_35 = arith.constant 1 : index
    %c0_36 = arith.constant 0 : index
    %c0_37 = arith.constant 0 : index
    %34 = vector.load %arg4[%c1_35, %c0_36, %c0_37] : memref<3x128x256xf32, #tpu.memory_space<vmem>>, vector<1x128x256xf32>
    %35 = vector.shape_cast %34 : vector<1x128x256xf32> to vector<128x256xf32>
    %cst_38 = arith.constant dense<0.000000e+00> : vector<30x256xf32>
    %36 = tpu.matmul %33, %35, %cst_38 {dimension_numbers = #tpu.dot_dimension_numbers<[1], [0], [0], [1], [0, 0, 1, 1], [], []>} : vector<30x128xf32>, vector<128x256xf32>, vector<30x256xf32> -> vector<30x256xf32>
    %37 = arith.addf %32, %36 : vector<30x256xf32>
    %c2_39 = arith.constant 2 : index
    %c0_40 = arith.constant 0 : index
    %38 = vector.load %arg14[%c2_39, %c0_40] : memref<32x128xf32, #tpu.memory_space<vmem>>, vector<30x128xf32>
    %c2_41 = arith.constant 2 : index
    %c0_42 = arith.constant 0 : index
    %c0_43 = arith.constant 0 : index
    %39 = vector.load %arg4[%c2_41, %c0_42, %c0_43] : memref<3x128x256xf32, #tpu.memory_space<vmem>>, vector<1x128x256xf32>
    %40 = vector.shape_cast %39 : vector<1x128x256xf32> to vector<128x256xf32>
    %cst_44 = arith.constant dense<0.000000e+00> : vector<30x256xf32>
    %41 = tpu.matmul %38, %40, %cst_44 {dimension_numbers = #tpu.dot_dimension_numbers<[1], [0], [0], [1], [0, 0, 1, 1], [], []>} : vector<30x128xf32>, vector<128x256xf32>, vector<30x256xf32> -> vector<30x256xf32>
    %42 = arith.addf %37, %41 : vector<30x256xf32>
    %43 = vector.extract_strided_slice %42 {offsets = [0, 0], sizes = [30, 128], strides = [1, 1]} : vector<30x256xf32> to vector<30x128xf32>
    %44 = vector.extract_strided_slice %42 {offsets = [0, 128], sizes = [30, 128], strides = [1, 1]} : vector<30x256xf32> to vector<30x128xf32>
    %45 = arith.maximumf %43, %44 : vector<30x128xf32>
    %c0_45 = arith.constant 0 : index
    %c0_46 = arith.constant 0 : index
    %46 = vector.load %arg15[%c0_45, %c0_46] : memref<32x128xf32, #tpu.memory_space<vmem>>, vector<30x128xf32>
    tpu.vector_store %arg15[%c0_45, %c0_46], %45 {strides = array<i32>} : memref<32x128xf32, #tpu.memory_space<vmem>>, vector<30x128xf32>,
    %cst_47 = arith.constant 0.000000e+00 : f32
    %47 = vector.broadcast %cst_47 : f32 to vector<2x128xf32>
    %c30 = arith.constant 30 : index
    %c0_48 = arith.constant 0 : index
    %48 = vector.load %arg15[%c30, %c0_48] : memref<32x128xf32, #tpu.memory_space<vmem>>, vector<2x128xf32>
    tpu.vector_store %arg15[%c30, %c0_48], %47 {strides = array<i32>} : memref<32x128xf32, #tpu.memory_space<vmem>>, vector<2x128xf32>,
    %c0_49 = arith.constant 0 : index
    %c0_50 = arith.constant 0 : index
    %49 = tpu.strided_load %arg15[%c0_49, %c0_50] {strides = array<i32: 2, 1>} : memref<32x128xf32, #tpu.memory_space<vmem>>, vector<16x128xf32>
    %c1_51 = arith.constant 1 : index
    %c0_52 = arith.constant 0 : index
    %50 = tpu.strided_load %arg15[%c1_51, %c0_52] {strides = array<i32: 2, 1>} : memref<32x128xf32, #tpu.memory_space<vmem>>, vector<16x128xf32>
    %51 = arith.maximumf %49, %50 : vector<16x128xf32>
    %c0_53 = arith.constant 0 : index
    %c0_54 = arith.constant 0 : index
    %52 = vector.load %arg5[%c0_53, %c0_54] : memref<1x128xf32, #tpu.memory_space<vmem>>, vector<1x128xf32>
    %53 = vector.broadcast %52 : vector<1x128xf32> to vector<16x128xf32>
    %54 = arith.addf %51, %53 : vector<16x128xf32>
    %cst_55 = arith.constant 0.000000e+00 : f32
    %55 = vector.broadcast %cst_55 : f32 to vector<16x128xf32>
    %56 = arith.maximumf %54, %55 : vector<16x128xf32>
    %c0_56 = arith.constant 0 : index
    %c0_57 = arith.constant 0 : index
    %57 = vector.load %arg16[%c0_56, %c0_57] : memref<16x128xf32, #tpu.memory_space<vmem>>, vector<16x128xf32>
    tpu.vector_store %arg16[%c0_56, %c0_57], %56 {strides = array<i32>} : memref<16x128xf32, #tpu.memory_space<vmem>>, vector<16x128xf32>,
    %c0_58 = arith.constant 0 : index
    %c0_59 = arith.constant 0 : index
    %58 = tpu.strided_load %arg16[%c0_58, %c0_59] {strides = array<i32: 8, 1>} : memref<16x128xf32, #tpu.memory_space<vmem>>, vector<2x128xf32>
    %c0_60 = arith.constant 0 : index
    %c0_61 = arith.constant 0 : index
    %c0_62 = arith.constant 0 : index
    %59 = vector.load %arg6[%c0_60, %c0_61, %c0_62] : memref<5x128x128xf32, #tpu.memory_space<vmem>>, vector<1x128x128xf32>
    %60 = vector.shape_cast %59 : vector<1x128x128xf32> to vector<128x128xf32>
    %cst_63 = arith.constant dense<0.000000e+00> : vector<2x128xf32>
    %61 = tpu.matmul %58, %60, %cst_63 {dimension_numbers = #tpu.dot_dimension_numbers<[1], [0], [0], [1], [0, 0, 1, 1], [], []>} : vector<2x128xf32>, vector<128x128xf32>, vector<2x128xf32> -> vector<2x128xf32>
    %c1_64 = arith.constant 1 : index
    %c0_65 = arith.constant 0 : index
    %62 = tpu.strided_load %arg16[%c1_64, %c0_65] {strides = array<i32: 8, 1>} : memref<16x128xf32, #tpu.memory_space<vmem>>, vector<2x128xf32>
    %c1_66 = arith.constant 1 : index
    %c0_67 = arith.constant 0 : index
    %c0_68 = arith.constant 0 : index
    %63 = vector.load %arg6[%c1_66, %c0_67, %c0_68] : memref<5x128x128xf32, #tpu.memory_space<vmem>>, vector<1x128x128xf32>
    %64 = vector.shape_cast %63 : vector<1x128x128xf32> to vector<128x128xf32>
    %cst_69 = arith.constant dense<0.000000e+00> : vector<2x128xf32>
    %65 = tpu.matmul %62, %64, %cst_69 {dimension_numbers = #tpu.dot_dimension_numbers<[1], [0], [0], [1], [0, 0, 1, 1], [], []>} : vector<2x128xf32>, vector<128x128xf32>, vector<2x128xf32> -> vector<2x128xf32>
    %66 = arith.addf %61, %65 : vector<2x128xf32>
    %c2_70 = arith.constant 2 : index
    %c0_71 = arith.constant 0 : index
    %67 = tpu.strided_load %arg16[%c2_70, %c0_71] {strides = array<i32: 8, 1>} : memref<16x128xf32, #tpu.memory_space<vmem>>, vector<2x128xf32>
    %c2_72 = arith.constant 2 : index
    %c0_73 = arith.constant 0 : index
    %c0_74 = arith.constant 0 : index
    %68 = vector.load %arg6[%c2_72, %c0_73, %c0_74] : memref<5x128x128xf32, #tpu.memory_space<vmem>>, vector<1x128x128xf32>
    %69 = vector.shape_cast %68 : vector<1x128x128xf32> to vector<128x128xf32>
    %cst_75 = arith.constant dense<0.000000e+00> : vector<2x128xf32>
    %70 = tpu.matmul %67, %69, %cst_75 {dimension_numbers = #tpu.dot_dimension_numbers<[1], [0], [0], [1], [0, 0, 1, 1], [], []>} : vector<2x128xf32>, vector<128x128xf32>, vector<2x128xf32> -> vector<2x128xf32>
    %71 = arith.addf %66, %70 : vector<2x128xf32>
    %c3 = arith.constant 3 : index
    %c0_76 = arith.constant 0 : index
    %72 = tpu.strided_load %arg16[%c3, %c0_76] {strides = array<i32: 8, 1>} : memref<16x128xf32, #tpu.memory_space<vmem>>, vector<2x128xf32>
    %c3_77 = arith.constant 3 : index
    %c0_78 = arith.constant 0 : index
    %c0_79 = arith.constant 0 : index
    %73 = vector.load %arg6[%c3_77, %c0_78, %c0_79] : memref<5x128x128xf32, #tpu.memory_space<vmem>>, vector<1x128x128xf32>
    %74 = vector.shape_cast %73 : vector<1x128x128xf32> to vector<128x128xf32>
    %cst_80 = arith.constant dense<0.000000e+00> : vector<2x128xf32>
    %75 = tpu.matmul %72, %74, %cst_80 {dimension_numbers = #tpu.dot_dimension_numbers<[1], [0], [0], [1], [0, 0, 1, 1], [], []>} : vector<2x128xf32>, vector<128x128xf32>, vector<2x128xf32> -> vector<2x128xf32>
    %76 = arith.addf %71, %75 : vector<2x128xf32>
    %c4 = arith.constant 4 : index
    %c0_81 = arith.constant 0 : index
    %77 = tpu.strided_load %arg16[%c4, %c0_81] {strides = array<i32: 8, 1>} : memref<16x128xf32, #tpu.memory_space<vmem>>, vector<2x128xf32>
    %c4_82 = arith.constant 4 : index
    %c0_83 = arith.constant 0 : index
    %c0_84 = arith.constant 0 : index
    %78 = vector.load %arg6[%c4_82, %c0_83, %c0_84] : memref<5x128x128xf32, #tpu.memory_space<vmem>>, vector<1x128x128xf32>
    %79 = vector.shape_cast %78 : vector<1x128x128xf32> to vector<128x128xf32>
    %cst_85 = arith.constant dense<0.000000e+00> : vector<2x128xf32>
    %80 = tpu.matmul %77, %79, %cst_85 {dimension_numbers = #tpu.dot_dimension_numbers<[1], [0], [0], [1], [0, 0, 1, 1], [], []>} : vector<2x128xf32>, vector<128x128xf32>, vector<2x128xf32> -> vector<2x128xf32>
    %81 = arith.addf %76, %80 : vector<2x128xf32>
    %c0_86 = arith.constant 0 : index
    %c0_87 = arith.constant 0 : index
    %82 = vector.load %arg7[%c0_86, %c0_87] : memref<1x128xf32, #tpu.memory_space<vmem>>, vector<1x128xf32>
    %83 = vector.broadcast %82 : vector<1x128xf32> to vector<2x128xf32>
    %84 = arith.addf %81, %83 : vector<2x128xf32>
    %cst_88 = arith.constant 0.000000e+00 : f32
    %85 = vector.broadcast %cst_88 : f32 to vector<2x128xf32>
    %86 = arith.maximumf %84, %85 : vector<2x128xf32>
    %c0_89 = arith.constant 0 : index
    %c0_90 = arith.constant 0 : index
    %87 = vector.load %arg8[%c0_89, %c0_90] : memref<128x128xf32, #tpu.memory_space<vmem>>, vector<128x128xf32>
    %cst_91 = arith.constant dense<0.000000e+00> : vector<2x128xf32>
    %88 = tpu.matmul %86, %87, %cst_91 {dimension_numbers = #tpu.dot_dimension_numbers<[1], [0], [0], [1], [0, 0, 1, 1], [], []>} : vector<2x128xf32>, vector<128x128xf32>, vector<2x128xf32> -> vector<2x128xf32>
    %c0_92 = arith.constant 0 : index
    %c0_93 = arith.constant 0 : index
    %89 = vector.load %arg9[%c0_92, %c0_93] : memref<1x128xf32, #tpu.memory_space<vmem>>, vector<1x128xf32>
    %90 = vector.broadcast %89 : vector<1x128xf32> to vector<2x128xf32>
    %91 = arith.addf %88, %90 : vector<2x128xf32>
    %cst_94 = arith.constant 0.000000e+00 : f32
    %92 = vector.broadcast %cst_94 : f32 to vector<2x128xf32>
    %93 = arith.maximumf %91, %92 : vector<2x128xf32>
    %c0_95 = arith.constant 0 : index
    %c0_96 = arith.constant 0 : index
    %94 = vector.load %arg10[%c0_95, %c0_96] : memref<128x128xf32, #tpu.memory_space<vmem>>, vector<128x128xf32>
    %cst_97 = arith.constant dense<0.000000e+00> : vector<2x128xf32>
    %95 = tpu.matmul %93, %94, %cst_97 {dimension_numbers = #tpu.dot_dimension_numbers<[1], [0], [0], [1], [0, 0, 1, 1], [], []>} : vector<2x128xf32>, vector<128x128xf32>, vector<2x128xf32> -> vector<2x128xf32>
    %c0_98 = arith.constant 0 : index
    %c0_99 = arith.constant 0 : index
    %96 = vector.load %arg11[%c0_98, %c0_99] : memref<1x128xf32, #tpu.memory_space<vmem>>, vector<1x128xf32>
    %97 = vector.broadcast %96 : vector<1x128xf32> to vector<2x128xf32>
    %98 = arith.addf %95, %97 : vector<2x128xf32>
    %c0_100 = arith.constant 0 : index
    %c0_101 = arith.constant 0 : index
    %99 = vector.load %arg12[%c0_100, %c0_101] : memref<2x128xf32, #tpu.memory_space<vmem>>, vector<2x128xf32>
    tpu.vector_store %arg12[%c0_100, %c0_101], %98 {strides = array<i32>} : memref<2x128xf32, #tpu.memory_space<vmem>>, vector<2x128xf32>,
    return
  }
  func.func @transform_0(%arg0: i32) -> (i32, i32) {
    %c0_i32 = arith.constant 0 : i32
    %c0_i32_0 = arith.constant 0 : i32
    return %arg0, %c0_i32 : i32, i32
  }
  func.func @transform_1(%arg0: i32) -> (i32, i32, i32) {
    %c0_i32 = arith.constant 0 : i32
    %c0_i32_0 = arith.constant 0 : i32
    %c0_i32_1 = arith.constant 0 : i32
    %c0_i32_2 = arith.constant 0 : i32
    return %c0_i32, %c0_i32_0, %c0_i32_1 : i32, i32, i32
  }
  func.func @transform_2(%arg0: i32) -> (i32, i32) {
    %c0_i32 = arith.constant 0 : i32
    %c0_i32_0 = arith.constant 0 : i32
    %c0_i32_1 = arith.constant 0 : i32
    return %c0_i32, %c0_i32_0 : i32, i32
  }
  func.func @transform_3(%arg0: i32) -> (i32, i32, i32) {
    %c0_i32 = arith.constant 0 : i32
    %c0_i32_0 = arith.constant 0 : i32
    %c0_i32_1 = arith.constant 0 : i32
    %c0_i32_2 = arith.constant 0 : i32
    return %c0_i32, %c0_i32_0, %c0_i32_1 : i32, i32, i32
  }
  func.func @transform_4(%arg0: i32) -> (i32, i32) {
    %c0_i32 = arith.constant 0 : i32
    %c0_i32_0 = arith.constant 0 : i32
    %c0_i32_1 = arith.constant 0 : i32
    return %c0_i32, %c0_i32_0 : i32, i32
  }
  func.func @transform_5(%arg0: i32) -> (i32, i32, i32) {
    %c0_i32 = arith.constant 0 : i32
    %c0_i32_0 = arith.constant 0 : i32
    %c0_i32_1 = arith.constant 0 : i32
    %c0_i32_2 = arith.constant 0 : i32
    return %c0_i32, %c0_i32_0, %c0_i32_1 : i32, i32, i32
  }
  func.func @transform_6(%arg0: i32) -> (i32, i32) {
    %c0_i32 = arith.constant 0 : i32
    %c0_i32_0 = arith.constant 0 : i32
    %c0_i32_1 = arith.constant 0 : i32
    return %c0_i32, %c0_i32_0 : i32, i32
  }
  func.func @transform_7(%arg0: i32) -> (i32, i32) {
    %c0_i32 = arith.constant 0 : i32
    %c0_i32_0 = arith.constant 0 : i32
    %c0_i32_1 = arith.constant 0 : i32
    return %c0_i32, %c0_i32_0 : i32, i32
  }
  func.func @transform_8(%arg0: i32) -> (i32, i32) {
    %c0_i32 = arith.constant 0 : i32
    %c0_i32_0 = arith.constant 0 : i32
    %c0_i32_1 = arith.constant 0 : i32
    return %c0_i32, %c0_i32_0 : i32, i32
  }
  func.func @transform_9(%arg0: i32) -> (i32, i32) {
    %c0_i32 = arith.constant 0 : i32
    %c0_i32_0 = arith.constant 0 : i32
    %c0_i32_1 = arith.constant 0 : i32
    return %c0_i32, %c0_i32_0 : i32, i32
  }
  func.func @transform_10(%arg0: i32) -> (i32, i32) {
    %c0_i32 = arith.constant 0 : i32
    %c0_i32_0 = arith.constant 0 : i32
    %c0_i32_1 = arith.constant 0 : i32
    return %c0_i32, %c0_i32_0 : i32, i32
  }
  func.func @transform_11(%arg0: i32) -> (i32, i32) {
    %c0_i32 = arith.constant 0 : i32
    %c0_i32_0 = arith.constant 0 : i32
    return %arg0, %c0_i32 : i32, i32
  }
}

</mosaic_0001>

<bundles_post_ra>
// kernel: image_model_forward.1
= control target key start
LH: loop header
LB: loop body
LE: loop exit
PB: predicated region body
PF: predicated region fallthrough
CT: control target
= control target key end

     0   :  { %16 = vsyncpa [#allocation7], 0  ;;  %s1825_s0 = inlined_call_operand.vmem [shape: f32[64,28], index: 0, kind: input, shape index: {}]   ;;  %s1826_s1 = inlined_call_operand.vmem [shape: f32[3,28,256], index: 1, kind: input, shape index: {}]   ;;  %s1827_s2 = inlined_call_operand.vmem [shape: f32[1,128], index: 2, kind: input, shape index: {}]   ;;  %s1828_s3 = inlined_call_operand.hbm [shape: f32[3,128,256], index: 3, kind: input, shape index: {}]   ;;  %s1829_s4 = inlined_call_operand.vmem [shape: f32[1,128], index: 4, kind: input, shape index: {}]   ;;  %s1830_s5 = inlined_call_operand.hbm [shape: f32[5,128,128], index: 5, kind: input, shape index: {}]   ;;  %s1831_s6 = inlined_call_operand.vmem [shape: f32[1,128], index: 6, kind: input, shape index: {}]   ;;  %s1832_s7 = inlined_call_operand.vmem [shape: f32[128,128], index: 7, kind: input, shape index: {}]   ;;  %s1833_s8 = inlined_call_operand.vmem [shape: f32[1,128], index: 8, kind: input, shape index: {}]   ;;  %s1834_s9 = inlined_call_operand.hbm [shape: f32[128,128], index: 9, kind: input, shape index: {}]   ;;  %s1835_s10 = inlined_call_operand.vmem [shape: f32[1,128], index: 10, kind: input, shape index: {}]   ;;  %s1836_s11 = inlined_call_operand.hbm [shape: f32[2,128], index: 11, kind: output, shape index: {}]  }
   0x1   :  { %17 = vsyncpa [#allocation10], 0  ;;  %s44_s19 = sshll.u32 %s1830_s5, 4  ;;  %s45_s19 = int_to_ptr.hbm [resolvable:$true] %s44_s19 }
   0x2   :  { %18 = vsyncpa [#allocation8], 0  ;;  %s1362_s20 = smov [#allocation9]   ;;  %s29_s24 = sshll.u32 %s1828_s3, 4  ;;  %s30_s24 = int_to_ptr.hbm [resolvable:$true] %s29_s24 }
   0x3   :  { %s46_s21 = sshll.u32 %s1362_s20, 4  ;;  %s1363_s25 = smov 128   ;;  %s47_s21 = int_to_ptr.vmem [resolvable:$true] %s46_s21 }
   0x4   :  { %s1364_s26 = smov 8   ;;  %s1365_s27 = smov [#allocation6]  }
   0x5   :  { %52 = dma.hbm_to_vmem [thread:$0]  %s45_s19, 10240, %s47_s21, [#allocation10], %s1363_s25, %s1363_s25, %s1364_s26  }
   0x6   :  { %s31_s28 = sshll.u32 %s1365_s27, 4  ;;  %s1366_s29 = smov 256   ;;  %s32_s28 = int_to_ptr.vmem [resolvable:$true] %s31_s28 }
   0x7   :  { %s1367_s30 = smov 16   ;;  %s63_s13 = sshll.u32 %s1834_s9, 4  ;;  %s64_s13 = int_to_ptr.hbm [resolvable:$true] %s63_s13 }
   0x8   :  { %37 = dma.hbm_to_vmem [thread:$0]  %s30_s24, 12288, %s32_s28, [#allocation7], %s1366_s29, %s1366_s29, %s1367_s30  }
   0x9   :  { %s1368_s14 = smov [#allocation11]  }
   0xa   :  { %s65_s15 = sshll.u32 %s1368_s14, 4  ;;  %s66_s15 = int_to_ptr.vmem [resolvable:$true] %s65_s15 }
   0xb   :  { %71 = dma.hbm_to_vmem [thread:$0]  %s64_s13, 2048, %s66_s15, [#allocation10], %s1363_s25, %s1363_s25, %s1364_s26  }
   0xc   :  { %1356 = dma.done.wait [#allocation7], 12288  }
   0xd   :  { %1357 = vsyncadd [#allocation7], 4294955008 }
   0xe   :  { %1358 = dma.done.wait [#allocation10], 12288  }
   0xf   :  { %1359 = vsyncadd [#allocation10], 4294955008  ;;  %vm144_vm0 = vcmask 1043456   ;;  %v1170_v0 = vld [vmem:[%s1826_s1 + $0x70] sm:$0xf]  ;;  %v1168_v1 = vld [vmem:[%s1826_s1 + $0x60] sm:$0xff] }
  0x10   :  { %1172 = vmatpush.msk.msra.mxu0 %vm144_vm0, %v1170_v0  ;;  %1234 = vmatpush.msk.msra.mxu1 %vm144_vm0, %v1170_v0  ;;  %v1166_v2 = vld [vmem:[%s1826_s1 + $0x50] sm:$0xff]  ;;  %v1164_v3 = vld [vmem:[%s1826_s1 + $0x40] sm:$0xff]  ;;  %vm119_vm1 = vcmask 228352   ;;  %v1472_v7 = vld [vmem:[%s1825_s0 + $0x39] sm:$0x3f]  ;;  %s1370_s5 = smov [#allocation12]  }
  0x11   :  { %1235 = vmatpush.msk.msra.mxu2 %vm144_vm0, %v1170_v0  ;;  %1236 = vmatpush.msk.msra.mxu3 %vm144_vm0, %v1170_v0  ;;  %v102_v4 = vld [vmem:[%s1825_s0 + $0x1] sm:$0xff]  ;;  %v1462_v5 = vld [vmem:[%s1825_s0 + $0x29] sm:$0xff]  ;;  %v1467_v6 = vld [vmem:[%s1825_s0 + $0x31] sm:$0xff]  ;;  %s1151_s12 = sshll.u32 %s1370_s5, 4  ;;  %s1153_s15 = sshll.u32 %s1836_s11, 4  ;;  %s1152_s12 = int_to_ptr.vmem [resolvable:$true] %s1151_s12  ;;  %s1154_s15 = int_to_ptr.hbm [resolvable:$true] %s1153_s15 }
  0x12   :  { %164 = vmatpush.msra.mxu0 %v1168_v1  ;;  %1237 = vmatpush.msra.mxu1 %v1168_v1  ;;  %v1171_v8 = vld [vmem:[%s1826_s1 + $0x78] sm:$0xf]  ;;  %v100_v9 = vld [vmem:[%s1826_s1 + $0x30] sm:$0xf]  ;;  %v1169_v11 = vld [vmem:[%s1826_s1 + $0x68] sm:$0xff] }
  0x13   :  { %1238 = vmatpush.msra.mxu2 %v1168_v1  ;;  %1239 = vmatpush.msra.mxu3 %v1168_v1  ;;  %v101_v10 = vld [vmem:[%s1826_s1 + $0x38] sm:$0xf]  ;;  %v98_v12 = vld [vmem:[%s1826_s1 + $0x20] sm:$0xff]  ;;  %v99_v13 = vld [vmem:[%s1826_s1 + $0x28] sm:$0xff] }
  0x14   :  { %165 = vmatpush.msra.mxu0 %v1166_v2  ;;  %1240 = vmatpush.msra.mxu1 %v1166_v2  ;;  %v1167_v14 = vld [vmem:[%s1826_s1 + $0x58] sm:$0xff]  ;;  %v96_v15 = vld [vmem:[%s1826_s1 + $0x10] sm:$0xff]  ;;  %v1212_v18 = vld [vmem:[%s1826_s1 + $0xa0] sm:$0xff] }
  0x15   :  { %1241 = vmatpush.msra.mxu2 %v1166_v2  ;;  %1242 = vmatpush.msra.mxu3 %v1166_v2  ;;  %v1214_v16 = vld [vmem:[%s1826_s1 + $0xb0] sm:$0xf]  ;;  %v97_v17 = vld [vmem:[%s1826_s1 + $0x18] sm:$0xff]  ;;  %v1165_v19 = vld [vmem:[%s1826_s1 + $0x48] sm:$0xff] }
  0x16   :  { %166 = vmatpush.msra.mxu0 %v1164_v3  ;;  %1243 = vmatpush.msra.mxu1 %v1164_v3  ;;  %v94_v20 = vld [vmem:[%s1826_s1] sm:$0xff]  ;;  %v95_v21 = vld [vmem:[%s1826_s1 + $0x8] sm:$0xff]  ;;  %v1215_v24 = vld [vmem:[%s1826_s1 + $0xb8] sm:$0xf] }
  0x17   :  { %1244 = vmatpush.msra.mxu2 %v1164_v3  ;;  %1245 = vmatpush.msra.mxu3 %v1164_v3  ;;  %v103_v22 = vld [vmem:[%s1825_s0 + $0x9] sm:$0xff]  ;;  %v86_v23 = vld [vmem:[%s1825_s0] sm:$0xff]  ;;  %v1211_v28 = vld [vmem:[%s1826_s1 + $0x98] sm:$0xff] }
  0x18   :  { %1173 = vmatmul.msk.f32.vlgmr.msra.gmra.mxu0 %vm119_vm1, %v102_v4  ;;  %1178 = vmatmul.msk.f32.vlgmr.msra.gmra.mxu1 %vm119_vm1, %v1462_v5  ;;  %v1210_v25 = vld [vmem:[%s1826_s1 + $0x90] sm:$0xff]  ;;  %v1213_v26 = vld [vmem:[%s1826_s1 + $0xa8] sm:$0xff]  ;;  %v1208_v27 = vld [vmem:[%s1826_s1 + $0x80] sm:$0xff] }
  0x19   :  { %1179 = vmatmul.msk.f32.vlgmr.msra.gmra.mxu2 %vm119_vm1, %v1467_v6  ;;  %1180 = vmatmul.msk.f32.vlgmr.msra.gmra.mxu3 %vm119_vm1, %v1472_v7  ;;  %v104_v29 = vld [vmem:[%s1825_s0 + $0x11] sm:$0xff]  ;;  %v87_v30 = vld [vmem:[%s1825_s0 + $0x8] sm:$0xff]  ;;  %v105_v31 = vld [vmem:[%s1825_s0 + $0x19] sm:$0xff] }
  0x1a   :  { %1181 = vmatpush.msk.msrb.mxu1 %vm144_vm0, %v1171_v8  ;;  %1190 = vmatpush.msk.msrb.mxu2 %vm144_vm0, %v100_v9  ;;  %v88_v32 = vld [vmem:[%s1825_s0 + $0x10] sm:$0xff]  ;;  %v1209_v33 = vld [vmem:[%s1826_s1 + $0x88] sm:$0xff]  ;;  %v89_v35 = vld [vmem:[%s1825_s0 + $0x18] sm:$0xff] }
  0x1b   :  { %1199 = vmatpush.msk.msrb.mxu3 %vm144_vm0, %v101_v10  ;;  %1216 = vmatpush.msk.msrb.mxu0 %vm144_vm0, %v1214_v16  ;;  %v106_v34 = vld [vmem:[%s1825_s0 + $0x21] sm:$0xff]  ;;  %v346_v38 = vld [vmem:[%s1825_s0 + $0xa] sm:$0xff]  ;;  %v347_v40 = vld [vmem:[%s1825_s0 + $0x12] sm:$0xff] }
  0x1c   :  { %205 = vmatpush.msrb.mxu1 %v1169_v11  ;;  %276 = vmatpush.msrb.mxu2 %v98_v12  ;;  %v345_v36 = vld [vmem:[%s1825_s0 + $0x2] sm:$0xff]  ;;  %v92_v41 = vld [vmem:[%s1825_s0 + $0x30] sm:$0xff]  ;;  %v348_v42 = vld [vmem:[%s1825_s0 + $0x1a] sm:$0xff] }
  0x1d   :  { %317 = vmatpush.msrb.mxu3 %v99_v13  ;;  %405 = vmatpush.msrb.mxu0 %v1212_v18  ;;  %v90_v37 = vld [vmem:[%s1825_s0 + $0x20] sm:$0xff]  ;;  %v91_v39 = vld [vmem:[%s1825_s0 + $0x28] sm:$0xff]  ;;  %v93_v43 = vld [vmem:[%s1825_s0 + $0x38] sm:$0x3f] }
  0x1e   :  { %206 = vmatpush.msrb.mxu1 %v1167_v14  ;;  %277 = vmatpush.msrb.mxu2 %v96_v15  ;;  %v349_v44 = vld [vmem:[%s1825_s0 + $0x22] sm:$0xff]  ;;  %v350_v45 = vld [vmem:[%s1825_s0 + $0x2a] sm:$0xff]  ;;  %v351_v46 = vld [vmem:[%s1825_s0 + $0x32] sm:$0xff] }
  0x1f   :  { %318 = vmatpush.msrb.mxu3 %v97_v17  ;;  %406 = vmatpush.msrb.mxu0 %v1210_v25  ;;  %v352_v47 = vld [vmem:[%s1825_s0 + $0x3a] sm:$0x3f]  ;;  %v613_v60 = vld [vmem:[#allocation6 + $0x1f0] sm:$0xff]  ;;  %v614_v61 = vld [vmem:[#allocation6 + $0x1f8] sm:$0xff] }
  0x20   :  { %207 = vmatpush.msrb.mxu1 %v1165_v19  ;;  %278 = vmatpush.msrb.mxu2 %v94_v20  ;;  %v611_v62 = vld [vmem:[#allocation6 + $0x1e0] sm:$0xff]  ;;  %v612_v0 = vld [vmem:[#allocation6 + $0x1e8] sm:$0xff]  ;;  %v609_v8 = vld [vmem:[#allocation6 + $0x1d0] sm:$0xff] }
  0x21   :  { %319 = vmatpush.msrb.mxu3 %v95_v21  ;;  %1174 = vmatmul.msk.f32.gmra.mxu0 %vm119_vm1, %v103_v22  ;;  %v610_v9 = vld [vmem:[#allocation6 + $0x1d8] sm:$0xff]  ;;  %v607_v10 = vld [vmem:[#allocation6 + $0x1c0] sm:$0xff]  ;;  %v608_v11 = vld [vmem:[#allocation6 + $0x1c8] sm:$0xff] }
  0x22   :  { %1182 = vmatmul.msk.f32.vlgmr.msrb.gmra.mxu1 %vm119_vm1, %v102_v4  ;;  %1191 = vmatmul.msk.f32.vlgmr.msrb.gmra.mxu2 %vm119_vm1, %v86_v23  ;;  %v605_v12 = vld [vmem:[#allocation6 + $0x1b0] sm:$0xff]  ;;  %v606_v14 = vld [vmem:[#allocation6 + $0x1b8] sm:$0xff]  ;;  %v764_v15 = vld [vmem:[#allocation6 + $0x2e0] sm:$0xff] }
  0x23   :  { %1200 = vmatmul.msk.f32.vlgmr.msrb.gmra.mxu3 %vm119_vm1, %v86_v23  ;;  %1225 = vmatpush.msk.msra.mxu1 %vm144_vm0, %v1215_v24  ;;  %v765_v16 = vld [vmem:[#allocation6 + $0x2e8] sm:$0xff]  ;;  %v762_v19 = vld [vmem:[#allocation6 + $0x2d0] sm:$0xff]  ;;  %v763_v20 = vld [vmem:[#allocation6 + $0x2d8] sm:$0xff] }
  0x24   :  { %407 = vmatpush.msrb.mxu0 %v1208_v27  ;;  %615 = vmatpush.msra.mxu2 %v613_v60  ;;  %v603_v21 = vld [vmem:[#allocation6 + $0x1a0] sm:$0xff]  ;;  %v761_v25 = vld [vmem:[#allocation6 + $0x2c8] sm:$0xff]  ;;  %v759_v27 = vld [vmem:[#allocation6 + $0x2b8] sm:$0xff] }
  0x25   :  { %446 = vmatpush.msra.mxu1 %v1213_v26  ;;  %644 = vmatpush.msra.mxu3 %v614_v61  ;;  %v760_v24 = vld [vmem:[#allocation6 + $0x2c0] sm:$0xff]  ;;  %v758_v26 = vld [vmem:[#allocation6 + $0x2b0] sm:$0xff]  ;;  %v751_v60 = vld [vmem:[#allocation6 + $0x278] sm:$0xff] }
  0x26   :  { %616 = vmatpush.msra.mxu2 %v611_v62  ;;  %v595_v61 = vld [vmem:[#allocation6 + $0x160] sm:$0xff]  ;;  %v596_v62 = vld [vmem:[#allocation6 + $0x168] sm:$0xff] }
  0x27   :  { %447 = vmatpush.msra.mxu1 %v1211_v28  ;;  %645 = vmatpush.msra.mxu3 %v612_v0 }
  0x28   :  { %617 = vmatpush.msra.mxu2 %v609_v8  ;;  %v594_v8 = vld [vmem:[#allocation6 + $0x158] sm:$0xff] }
  0x29   :  { %1175 = vmatmul.msk.f32.gmra.mxu0 %vm119_vm1, %v104_v29  ;;  %448 = vmatpush.msra.mxu1 %v1209_v33  ;;  %v601_v33 = vld [vmem:[#allocation6 + $0x190] sm:$0xff] }
  0x2a   :  { %1183 = vmatmul.msk.f32.gmra.mxu1 %vm119_vm1, %v103_v22  ;;  %1192 = vmatmul.msk.f32.gmra.mxu2 %vm119_vm1, %v87_v30  ;;  %v604_v22 = vld [vmem:[#allocation6 + $0x1a8] sm:$0xff] }
  0x2b   :  { %1201 = vmatmul.msk.f32.gmra.mxu3 %vm119_vm1, %v87_v30  ;;  %618 = vmatpush.msra.mxu2 %v607_v10  ;;  %v756_v30 = vld [vmem:[#allocation6 + $0x2a0] sm:$0xff] }
  0x2c   :  { %646 = vmatpush.msra.mxu3 %v610_v9 }
  0x2d   :  { %619 = vmatpush.msra.mxu2 %v605_v12  ;;  %v747_v12 = vld [vmem:[#allocation6 + $0x258] sm:$0xff] }
  0x2e   :  { %647 = vmatpush.msra.mxu3 %v608_v11  ;;  %v746_v11 = vld [vmem:[#allocation6 + $0x250] sm:$0xff] }
  0x2f   :  { %620 = vmatpush.msra.mxu2 %v603_v21  ;;  %v742_v21 = vld [vmem:[#allocation6 + $0x230] sm:$0xff] }
  0x30   :  { %648 = vmatpush.msra.mxu3 %v606_v14 }
  0x31   :  { %1176 = vmatmul.msk.f32.gmra.mxu0 %vm119_vm1, %v105_v31  ;;  %621 = vmatpush.msra.mxu2 %v601_v33 }
  0x32   :  { %1184 = vmatmul.msk.f32.gmra.mxu1 %vm119_vm1, %v104_v29  ;;  %1193 = vmatmul.msk.f32.gmra.mxu2 %vm119_vm1, %v88_v32 }
  0x33   :  { %1202 = vmatmul.msk.f32.gmra.mxu3 %vm119_vm1, %v88_v32 }
  0x34   :  { %649 = vmatpush.msra.mxu3 %v604_v22  ;;  %v743_v22 = vld [vmem:[#allocation6 + $0x238] sm:$0xff] }
  0x39   :  { %1177 = vmatmul.msk.f32.gmra.mxu0 %vm119_vm1, %v106_v34 }
  0x3a   :  { %1185 = vmatmul.msk.f32.gmra.mxu1 %vm119_vm1, %v105_v31  ;;  %1194 = vmatmul.msk.f32.gmra.mxu2 %vm119_vm1, %v89_v35  ;;  %v757_v31 = vld [vmem:[#allocation6 + $0x2a8] sm:$0xff] }
  0x3b   :  { %1203 = vmatmul.msk.f32.gmra.mxu3 %vm119_vm1, %v89_v35 }
  0x41   :  { %1217 = vmatmul.msk.f32.vlgmr.msrb.gmra.mxu0 %vm119_vm1, %v345_v36 }
  0x42   :  { %1186 = vmatmul.msk.f32.gmra.mxu1 %vm119_vm1, %v106_v34  ;;  %1195 = vmatmul.msk.f32.gmra.mxu2 %vm119_vm1, %v90_v37  ;;  %v602_v34 = vld [vmem:[#allocation6 + $0x198] sm:$0xff] }
  0x43   :  { %1204 = vmatmul.msk.f32.gmra.mxu3 %vm119_vm1, %v90_v37 }
  0x44   :  { %650 = vmatpush.msra.mxu3 %v602_v34 }
  0x49   :  { %1218 = vmatmul.msk.f32.gmra.mxu0 %vm119_vm1, %v346_v38 }
  0x4a   :  { %1187 = vmatmul.msk.f32.gmra.mxu1 %vm119_vm1, %v1462_v5  ;;  %1196 = vmatmul.msk.f32.gmra.mxu2 %vm119_vm1, %v91_v39 }
  0x4b   :  { %1205 = vmatmul.msk.f32.gmra.mxu3 %vm119_vm1, %v91_v39  ;;  %v755_v39 = vld [vmem:[#allocation6 + $0x298] sm:$0xff] }
  0x51   :  { %1219 = vmatmul.msk.f32.gmra.mxu0 %vm119_vm1, %v347_v40 }
  0x52   :  { %1188 = vmatmul.msk.f32.gmra.mxu1 %vm119_vm1, %v1467_v6  ;;  %1197 = vmatmul.msk.f32.gmra.mxu2 %vm119_vm1, %v92_v41  ;;  %v766_v6 = vld [vmem:[#allocation6 + $0x2f0] sm:$0xff] }
  0x53   :  { %1206 = vmatmul.msk.f32.gmra.mxu3 %vm119_vm1, %v92_v41  ;;  %768 = vmatpush.msra.mxu0 %v766_v6  ;;  %v599_v41 = vld [vmem:[#allocation6 + $0x180] sm:$0xff] }
  0x54   :  { %622 = vmatpush.msra.mxu2 %v599_v41 }
  0x55   :  { %769 = vmatpush.msra.mxu0 %v764_v15  ;;  %v744_v15 = vld [vmem:[#allocation6 + $0x240] sm:$0xff] }
  0x57   :  { %770 = vmatpush.msra.mxu0 %v762_v19  ;;  %v589_v19 = vld [vmem:[#allocation6 + $0x130] sm:$0xff] }
  0x59   :  { %1220 = vmatmul.msk.f32.gmra.mxu0 %vm119_vm1, %v348_v42 }
  0x5a   :  { %1189 = vmatmul.msk.f32.gmra.mxu1 %vm119_vm1, %v1472_v7  ;;  %1198 = vmatmul.msk.f32.gmra.mxu2 %vm119_vm1, %v93_v43  ;;  %v767_v7 = vld [vmem:[#allocation6 + $0x2f8] sm:$0xff] }
  0x5b   :  { %1207 = vmatmul.msk.f32.gmra.mxu3 %vm119_vm1, %v93_v43  ;;  %797 = vmatpush.msrb.mxu1 %v767_v7  ;;  %v593_v7 = vld [vmem:[#allocation6 + $0x150] sm:$0xff] }
  0x5c   :  { %771 = vmatpush.msra.mxu0 %v760_v24  ;;  %v587_v24 = vld [vmem:[#allocation6 + $0x120] sm:$0xff] }
  0x5d   :  { %798 = vmatpush.msrb.mxu1 %v765_v16  ;;  %v745_v16 = vld [vmem:[#allocation6 + $0x248] sm:$0xff] }
  0x5e   :  { %772 = vmatpush.msra.mxu0 %v758_v26 }
  0x5f   :  { %799 = vmatpush.msrb.mxu1 %v763_v20  ;;  %v590_v20 = vld [vmem:[#allocation6 + $0x138] sm:$0xff] }
  0x60   :  { %773 = vmatpush.msra.mxu0 %v756_v30 }
  0x61   :  { %1221 = vmatmul.msk.f32.gmra.mxu0 %vm119_vm1, %v349_v44  ;;  %800 = vmatpush.msrb.mxu1 %v761_v25  ;;  %v588_v25 = vld [vmem:[#allocation6 + $0x128] sm:$0xff] }
  0x62   :  { %1226 = vmatmul.msk.f32.vlgmr.msra.gmra.mxu1 %vm119_vm1, %v345_v36 }
  0x63   :  { %801 = vmatpush.msrb.mxu1 %v759_v27 }
  0x65   :  { %802 = vmatpush.msrb.mxu1 %v757_v31  ;;  %v585_v31 = vld [vmem:[#allocation6 + $0x110] sm:$0xff] }
  0x67   :  { %803 = vmatpush.msrb.mxu1 %v755_v39  ;;  %v737_v39 = vld [vmem:[#allocation6 + $0x208] sm:$0xff] }
  0x69   :  { %1222 = vmatmul.msk.f32.gmra.mxu0 %vm119_vm1, %v350_v45 }
  0x6a   :  { %1227 = vmatmul.msk.f32.gmra.mxu1 %vm119_vm1, %v346_v38  ;;  %v754_v38 = vld [vmem:[#allocation6 + $0x290] sm:$0xff] }
  0x6b   :  { %774 = vmatpush.msra.mxu0 %v754_v38  ;;  %v736_v38 = vld [vmem:[#allocation6 + $0x200] sm:$0xff] }
  0x71   :  { %1223 = vmatmul.msk.f32.gmra.mxu0 %vm119_vm1, %v351_v46 }
  0x72   :  { %1228 = vmatmul.msk.f32.gmra.mxu1 %vm119_vm1, %v347_v40 }
  0x79   :  { %1224 = vmatmul.msk.f32.gmra.mxu0 %vm119_vm1, %v352_v47 }
  0x7a   :  { %1229 = vmatmul.msk.f32.gmra.mxu1 %vm119_vm1, %v348_v42  ;;  %v600_v42 = vld [vmem:[#allocation6 + $0x188] sm:$0xff] }
  0x7b   :  { %651 = vmatpush.msra.mxu3 %v600_v42 }
  0x82   :  { %1230 = vmatmul.msk.f32.gmra.mxu1 %vm119_vm1, %v349_v44  ;;  %v752_v44 = vld [vmem:[#allocation6 + $0x280] sm:$0xff] }
  0x83   :  { %775 = vmatpush.msra.mxu0 %v752_v44 }
  0x8a   :  { %1231 = vmatmul.msk.f32.gmra.mxu1 %vm119_vm1, %v350_v45  ;;  %v753_v45 = vld [vmem:[#allocation6 + $0x288] sm:$0xff] }
  0x8b   :  { %804 = vmatpush.msrb.mxu1 %v753_v45 }
  0x8d   :  { %805 = vmatpush.msrb.mxu1 %v751_v60 }
  0x92   :  { %1232 = vmatmul.msk.f32.gmra.mxu1 %vm119_vm1, %v351_v46 }
  0x95   :  { %v1652_v48 = vpop.f32.mrf.mxu1  ;;  %v1655_v49 = vpop.f32.mrf.mxu0 }
  0x9a   :  { %1233 = vmatmul.msk.f32.gmra.mxu1 %vm119_vm1, %v352_v47  ;;  %v597_v47 = vld [vmem:[#allocation6 + $0x170] sm:$0xff] }
  0x9b   :  { %623 = vmatpush.msra.mxu2 %v597_v47 }
  0x9c   :  { %v1673_v58 = vpop.f32.mrf.mxu2  ;;  %v1675_v59 = vpop.f32.mrf.mxu3 }
  0x9d   :  { %624 = vmatpush.msra.mxu2 %v595_v61 }
  0x9e   :  { %v1659_v51 = vpop.f32.mrf.mxu0 }
  0x9f   :  { %v1657_v50 = vpop.f32.mrf.mxu1  ;;  %625 = vmatpush.msra.mxu2 %v593_v7 }
  0xa5   :  { %v280_v2 = vpop.f32.mrf.mxu2 }
  0xa6   :  { %v1665_v54 = vpop.f32.mrf.mxu0  ;;  %v321_v3 = vpop.f32.mrf.mxu3  ;;  %v281_v28 = vadd.f32 %v280_v2, %v1655_v49  ;;  %v598_v49 = vld [vmem:[#allocation6 + $0x178] sm:$0xff] }
  0xa7   :  { %v1661_v52 = vpop.f32.mrf.mxu1  ;;  %v322_v29 = vadd.f32 %v321_v3, %v1657_v50  ;;  %v750_v50 = vld [vmem:[#allocation6 + $0x270] sm:$0xff]  ;;  %652 = vmatpush.msra.mxu3 %v598_v49  ;;  %v748_v3 = vld [vmem:[#allocation6 + $0x260] sm:$0xff] }
  0xa8   :  { %776 = vmatpush.msra.mxu0 %v750_v50 }
  0xa9   :  { %653 = vmatpush.msra.mxu3 %v596_v62 }
  0xaa   :  { %777 = vmatpush.msra.mxu0 %v748_v3  ;;  %v1369_v3 = vmov 0.0  }
  0xab   :  { %654 = vmatpush.msra.mxu3 %v594_v8  ;;  %506 = vst [vmem:[#allocation2 + $0x3e] sm:$0x3] %v1369_v3 }
  0xac   :  { %778 = vmatpush.msra.mxu0 %v746_v11  ;;  %842 = vst [vmem:[#allocation4 + $0x1e] sm:$0x3] %v1369_v3 }
  0xad   :  { %v1683_v13 = vpop.f32.mrf.mxu2 }
  0xae   :  { %v1669_v56 = vpop.f32.mrf.mxu0  ;;  %v1685_v17 = vpop.f32.mrf.mxu3  ;;  %v284_v0 = vadd.f32 %v1683_v13, %v1659_v51  ;;  %v591_v51 = vld [vmem:[#allocation6 + $0x140] sm:$0xff]  ;;  %779 = vmatpush.msra.mxu0 %v744_v15 }
  0xaf   :  { %v1663_v53 = vpop.f32.mrf.mxu1  ;;  %v325_v2 = vadd.f32 %v1685_v17, %v1661_v52  ;;  %v592_v52 = vld [vmem:[#allocation6 + $0x148] sm:$0xff]  ;;  %626 = vmatpush.msra.mxu2 %v591_v51  ;;  %v574_v15 = vld [vmem:[#allocation6 + $0xe0] sm:$0xff] }
  0xb0   :  { %655 = vmatpush.msra.mxu3 %v592_v52  ;;  %780 = vmatpush.msra.mxu0 %v742_v21  ;;  %v576_v52 = vld [vmem:[#allocation6 + $0xf0] sm:$0xff] }
  0xb1   :  { %627 = vmatpush.msra.mxu2 %v589_v19 }
  0xb2   :  { %656 = vmatpush.msra.mxu3 %v590_v20  ;;  %v573_v20 = vld [vmem:[#allocation6 + $0xd8] sm:$0xff] }
  0xb3   :  { %628 = vmatpush.msra.mxu2 %v587_v24 }
  0xb4   :  { %657 = vmatpush.msra.mxu3 %v588_v25 }
  0xb5   :  { %v1693_v35 = vpop.f32.mrf.mxu2  ;;  %629 = vmatpush.msra.mxu2 %v585_v31  ;;  %v566_v31 = vld [vmem:[#allocation6 + $0xa0] sm:$0xff] }
  0xb6   :  { %v1677_v63 = vpop.f32.mrf.mxu0  ;;  %v1695_v40 = vpop.f32.mrf.mxu3  ;;  %v287_v26 = vadd.f32 %v1693_v35, %v1665_v54  ;;  %v583_v54 = vld [vmem:[#allocation6 + $0x100] sm:$0xff] }
  0xb7   :  { %v1667_v55 = vpop.f32.mrf.mxu1  ;;  %v328_v27 = vadd.f32 %v1695_v40, %v1663_v53  ;;  %v584_v53 = vld [vmem:[#allocation6 + $0x108] sm:$0xff]  ;;  %630 = vmatpush.msra.mxu2 %v583_v54  ;;  %v1712_v40 = vld [vmem:[%s1827_s2] ss:$0 sm:$0xff] }
  0xb9   :  { %673 = vmatpush.msrb.mxu2 %v576_v52  ;;  %v548_v52 = vld [vmem:[#allocation6 + $0x10] sm:$0xff] }
  0xbb   :  { %674 = vmatpush.msrb.mxu2 %v574_v15  ;;  %v549_v15 = vld [vmem:[#allocation6 + $0x18] sm:$0xff] }
  0xbd   :  { %v289_v13 = vpop.f32.mrf.mxu2 }
  0xbe   :  { %v409_v4 = vpop.f32.mrf.mxu0  ;;  %v330_v17 = vpop.f32.mrf.mxu3 }
  0xbf   :  { %v1671_v57 = vpop.f32.mrf.mxu1  ;;  %v474_v36 = vadd.f32 %v409_v4, %v281_v28  ;;  %v749_v4 = vld [vmem:[#allocation6 + $0x268] sm:$0xff]  ;;  %v740_v28 = vld [vmem:[#allocation6 + $0x220] sm:$0xff]  ;;  %v331_v47 = vadd.f32 %v330_v17, %v1667_v55 }
  0xc0   :  { %806 = vmatpush.msrb.mxu1 %v749_v4  ;;  %781 = vmatpush.msra.mxu0 %v740_v28 }
  0xc2   :  { %807 = vmatpush.msrb.mxu1 %v747_v12 }
  0xc4   :  { %808 = vmatpush.msrb.mxu1 %v745_v16  ;;  %v575_v16 = vld [vmem:[#allocation6 + $0xe8] sm:$0xff] }
  0xc6   :  { %v1689_v23 = vpop.f32.mrf.mxu0  ;;  %809 = vmatpush.msrb.mxu1 %v743_v22  ;;  %v333_v45 = vpop.f32.mrf.mxu3  ;;  %v570_v22 = vld [vmem:[#allocation6 + $0xc0] sm:$0xff] }
  0xc7   :  { %v1679_v1 = vpop.f32.mrf.mxu1  ;;  %v476_v9 = vadd.f32 %v1689_v23, %v284_v0 }
  0xce   :  { %v1697_v46 = vpop.f32.mrf.mxu0  ;;  %v336_v55 = vpop.f32.mrf.mxu3 }
  0xcf   :  { %v1681_v5 = vpop.f32.mrf.mxu1  ;;  %v478_v33 = vadd.f32 %v1697_v46, %v287_v26  ;;  %v290_v46 = vadd.f32 %v289_v13, %v1669_v56  ;;  %v334_v56 = vadd.f32 %v333_v45, %v1671_v57  ;;  %v337_v17 = vadd.f32 %v336_v55, %v1679_v1  ;;  %v571_v26 = vld [vmem:[#allocation6 + $0xc8] sm:$0xff]  ;;  %v569_v1 = vld [vmem:[#allocation6 + $0xb8] sm:$0xff] }
  0xd6   :  { %v418_v23 = vpop.f32.mrf.mxu0  ;;  %v339_v28 = vpop.f32.mrf.mxu3 }
  0xd7   :  { %v1687_v18 = vpop.f32.mrf.mxu1  ;;  %v480_v61 = vadd.f32 %v418_v23, %v290_v46 }
  0xde   :  { %v421_v50 = vpop.f32.mrf.mxu0 }
  0xdf   :  { %v450_v32 = vpop.f32.mrf.mxu1 }
  0xe0   :  { %v475_v37 = vadd.f32 %v450_v32, %v322_v29  ;;  %v741_v29 = vld [vmem:[#allocation6 + $0x228] sm:$0xff]  ;;  %v586_v32 = vld [vmem:[#allocation6 + $0x118] sm:$0xff] }
  0xe1   :  { %658 = vmatpush.msra.mxu3 %v586_v32  ;;  %810 = vmatpush.msrb.mxu1 %v741_v29  ;;  %v568_v29 = vld [vmem:[#allocation6 + $0xb0] sm:$0xff]  ;;  %v567_v32 = vld [vmem:[#allocation6 + $0xa8] sm:$0xff] }
  0xe2   :  { %v490_v43 = vmax.f32 %v474_v36, %v475_v37  ;;  %v738_v36 = vld [vmem:[#allocation6 + $0x210] sm:$0xff]  ;;  %v739_v37 = vld [vmem:[#allocation6 + $0x218] sm:$0xff] }
  0xe3   :  { %659 = vmatpush.msra.mxu3 %v584_v53  ;;  %782 = vmatpush.msra.mxu0 %v738_v36  ;;  %v340_v36 = vadd.f32 %v339_v28, %v1681_v5 }
  0xe4   :  { %498 = vst [vmem:[#allocation2] sm:$0xff] %v490_v43  ;;  %811 = vmatpush.msrb.mxu1 %v739_v37  ;;  %v292_v43 = vpop.f32.mrf.mxu2  ;;  %v565_v37 = vld [vmem:[#allocation6 + $0x98] sm:$0xff] }
  0xe5   :  { %783 = vmatpush.msra.mxu0 %v736_v38  ;;  %v293_v4 = vadd.f32 %v292_v43, %v1677_v63  ;;  %v572_v63 = vld [vmem:[#allocation6 + $0xd0] sm:$0xff]  ;;  %v562_v38 = vld [vmem:[#allocation6 + $0x80] sm:$0xff] }
  0xe6   :  { %812 = vmatpush.msrb.mxu1 %v737_v39  ;;  %675 = vmatpush.msrb.mxu2 %v572_v63 }
  0xe7   :  { %v453_v6 = vpop.f32.mrf.mxu1  ;;  %v482_v8 = vadd.f32 %v421_v50, %v293_v4 }
  0xe8   :  { %v477_v10 = vadd.f32 %v453_v6, %v325_v2  ;;  %676 = vmatpush.msrb.mxu2 %v570_v22 }
  0xea   :  { %v491_v14 = vmax.f32 %v476_v9, %v477_v10  ;;  %v424_v10 = vpop.f32.mrf.mxu0  ;;  %677 = vmatpush.msrb.mxu2 %v568_v29 }
  0xec   :  { %499 = vst [vmem:[#allocation2 + $0x8] sm:$0xff] %v491_v14  ;;  %v295_v6 = vpop.f32.mrf.mxu2  ;;  %v577_v14 = vld [vmem:[#allocation6 + $0xf8] sm:$0xff]  ;;  %678 = vmatpush.msrb.mxu2 %v566_v31 }
  0xed   :  { %702 = vmatpush.msrb.mxu3 %v577_v14  ;;  %v296_v57 = vadd.f32 %v295_v6, %v1652_v48  ;;  %v557_v6 = vld [vmem:[#allocation6 + $0x58] sm:$0xff] }
  0xef   :  { %v456_v30 = vpop.f32.mrf.mxu1  ;;  %703 = vmatpush.msrb.mxu3 %v575_v16  ;;  %v484_v23 = vadd.f32 %v424_v10, %v296_v57  ;;  %v555_v10 = vld [vmem:[#allocation6 + $0x48] sm:$0xff]  ;;  %v546_v16 = vld [vmem:[#allocation6] sm:$0xff] }
  0xf0   :  { %v479_v34 = vadd.f32 %v456_v30, %v328_v27 }
  0xf1   :  { %704 = vmatpush.msrb.mxu3 %v573_v20 }
  0xf2   :  { %v492_v35 = vmax.f32 %v478_v33, %v479_v34  ;;  %v427_v30 = vpop.f32.mrf.mxu0  ;;  %v564_v33 = vld [vmem:[#allocation6 + $0x90] sm:$0xff] }
  0xf3   :  { %v507_v41 = vld [vmem:[#allocation2] ss:$2 sm:$0xff]  ;;  %v515_v42 = vld [vmem:[#allocation2 + $0x1] ss:$2 sm:$0xff]  ;;  %705 = vmatpush.msrb.mxu3 %v571_v26  ;;  %679 = vmatpush.msrb.mxu2 %v564_v33  ;;  %v891_v33 = vld [vmem:[#allocation9 + $0xc8] sm:$0xff] }
  0xf4   :  { %v522_v44 = vmax.f32 %v507_v41, %v515_v42  ;;  %500 = vst [vmem:[#allocation2 + $0x10] sm:$0xff] %v492_v35  ;;  %v298_v27 = vpop.f32.mrf.mxu2  ;;  %v563_v42 = vld [vmem:[#allocation6 + $0x88] sm:$0xff] }
  0xf5   :  { %706 = vmatpush.msrb.mxu3 %v569_v1  ;;  %v299_v34 = vadd.f32 %v298_v27, %v1673_v58  ;;  %v342_v58 = vpop.f32.mrf.mxu3  ;;  %680 = vmatpush.msrb.mxu2 %v562_v38  ;;  %v897_v27 = vld [vmem:[#allocation9 + $0xf8] sm:$0xff]  ;;  %v895_v1 = vld [vmem:[#allocation9 + $0xe8] sm:$0xff]  ;;  %v886_v38 = vld [vmem:[#allocation9 + $0xa0] sm:$0xff] }
  0xf6   :  { %v530_v49 = vadd.f32 %v1712_v40, %v522_v44  ;;  %v560_v44 = vld [vmem:[#allocation6 + $0x70] sm:$0xff] }
  0xf7   :  { %v459_v60 = vpop.f32.mrf.mxu1  ;;  %707 = vmatpush.msrb.mxu3 %v567_v32  ;;  %v486_v53 = vadd.f32 %v427_v30, %v299_v34  ;;  %681 = vmatpush.msrb.mxu2 %v560_v44  ;;  %v893_v30 = vld [vmem:[#allocation9 + $0xd8] sm:$0xff]  ;;  %v892_v32 = vld [vmem:[#allocation9 + $0xd0] sm:$0xff]  ;;  %v890_v34 = vld [vmem:[#allocation9 + $0xc0] sm:$0xff] }
  0xf8   :  { %v481_v62 = vadd.f32 %v459_v60, %v331_v47  ;;  %v1717_v0 = vmax.f32 %v530_v49, 0.0  ;;  %v561_v47 = vld [vmem:[#allocation6 + $0x78] sm:$0xff]  ;;  %v558_v60 = vld [vmem:[#allocation6 + $0x60] sm:$0xff] }
  0xf9   :  { %708 = vmatpush.msrb.mxu3 %v565_v37  ;;  %682 = vmatpush.msrb.mxu2 %v558_v60  ;;  %v994_v60 = vld [vmem:[#allocation9 + $0x1e8] sm:$0xff] }
  0xfa   :  { %v493_v2 = vmax.f32 %v480_v61, %v481_v62  ;;  %538 = vst [vmem:[#allocation3] sm:$0xff] %v1717_v0  ;;  %v430_v50 = vpop.f32.mrf.mxu0  ;;  %v559_v61 = vld [vmem:[#allocation6 + $0x68] sm:$0xff] }
  0xfb   :  { %709 = vmatpush.msrb.mxu3 %v563_v42  ;;  %v996_v42 = vld [vmem:[#allocation9 + $0x1f8] sm:$0xff] }
  0xfc   :  { %501 = vst [vmem:[#allocation2 + $0x18] sm:$0xff] %v493_v2  ;;  %v301_v45 = vpop.f32.mrf.mxu2  ;;  %v343_v2 = vadd.f32 %v342_v58, %v1687_v18  ;;  %v553_v18 = vld [vmem:[#allocation6 + $0x38] sm:$0xff]  ;;  %997 = vmatpush.msra.mxu1 %v996_v42  ;;  %v877_v58 = vld [vmem:[#allocation9 + $0x70] sm:$0xff]  ;;  %v945_v42 = vld [vmem:[#allocation9 + $0x120] sm:$0xff] }
  0xfd   :  { %v302_v62 = vadd.f32 %v301_v45, %v1675_v59  ;;  %710 = vmatpush.msrb.mxu3 %v561_v47  ;;  %v552_v59 = vld [vmem:[#allocation6 + $0x30] sm:$0xff] }
  0xfe   :  { %v884_v47 = vld [vmem:[#allocation9 + $0x90] sm:$0xff] }
  0xff   :  { %v462_v7 = vpop.f32.mrf.mxu1  ;;  %v488_v55 = vadd.f32 %v430_v50, %v302_v62  ;;  %711 = vmatpush.msrb.mxu3 %v559_v61  ;;  %v954_v50 = vld [vmem:[#allocation9 + $0x168] sm:$0xff]  ;;  %v875_v62 = vld [vmem:[#allocation9 + $0x60] sm:$0xff] }
 0x100   :  { %v483_v9 = vadd.f32 %v462_v7, %v334_v56  ;;  %v556_v56 = vld [vmem:[#allocation6 + $0x50] sm:$0xff]  ;;  %v883_v61 = vld [vmem:[#allocation9 + $0x88] sm:$0xff] }
 0x101   :  { %683 = vmatpush.msrb.mxu2 %v556_v56  ;;  %712 = vmatpush.msrb.mxu3 %v557_v6  ;;  %v874_v56 = vld [vmem:[#allocation9 + $0x58] sm:$0xff] }
 0x102   :  { %v494_v11 = vmax.f32 %v482_v8, %v483_v9  ;;  %v554_v9 = vld [vmem:[#allocation6 + $0x40] sm:$0xff]  ;;  %v952_v6 = vld [vmem:[#allocation9 + $0x158] sm:$0xff] }
 0x103   :  { %v509_v12 = vld [vmem:[#allocation2 + $0x10] ss:$2 sm:$0xff]  ;;  %v517_v51 = vld [vmem:[#allocation2 + $0x11] ss:$2 sm:$0xff]  ;;  %684 = vmatpush.msrb.mxu2 %v554_v9  ;;  %713 = vmatpush.msrb.mxu3 %v555_v10  ;;  %v1036_v9 = vld [vmem:[#allocation9 + $0x278] sm:$0xff] }
 0x104   :  { %v523_v13 = vmax.f32 %v509_v12, %v517_v51  ;;  %502 = vst [vmem:[#allocation2 + $0x20] sm:$0xff] %v494_v11  ;;  %v550_v12 = vld [vmem:[#allocation6 + $0x20] sm:$0xff]  ;;  %v551_v51 = vld [vmem:[#allocation6 + $0x28] sm:$0xff] }
 0x105   :  { %685 = vmatpush.msrb.mxu2 %v552_v59  ;;  %714 = vmatpush.msrb.mxu3 %v553_v18  ;;  %v873_v59 = vld [vmem:[#allocation9 + $0x50] sm:$0xff] }
 0x106   :  { %v531_v19 = vadd.f32 %v1712_v40, %v523_v13  ;;  %v951_v18 = vld [vmem:[#allocation9 + $0x150] sm:$0xff] }
 0x107   :  { %v465_v21 = vpop.f32.mrf.mxu1  ;;  %686 = vmatpush.msrb.mxu2 %v550_v12  ;;  %715 = vmatpush.msrb.mxu3 %v551_v51  ;;  %v991_v12 = vld [vmem:[#allocation9 + $0x1d0] sm:$0xff] }
 0x108   :  { %v485_v24 = vadd.f32 %v465_v21, %v337_v17  ;;  %v1725_v25 = vmax.f32 %v531_v19, 0.0  ;;  %v547_v17 = vld [vmem:[#allocation6 + $0x8] sm:$0xff] }
 0x109   :  { %687 = vmatpush.msrb.mxu2 %v548_v52  ;;  %716 = vmatpush.msrb.mxu3 %v549_v15  ;;  %v950_v15 = vld [vmem:[#allocation9 + $0x148] sm:$0xff] }
 0x10a   :  { %v495_v48 = vmax.f32 %v484_v23, %v485_v24  ;;  %539 = vst [vmem:[#allocation3 + $0x8] sm:$0xff] %v1725_v25 }
 0x10b   :  { %688 = vmatpush.msrb.mxu2 %v546_v16  ;;  %717 = vmatpush.msrb.mxu3 %v547_v17  ;;  %v990_v16 = vld [vmem:[#allocation9 + $0x1c8] sm:$0xff] }
 0x10c   :  { %503 = vst [vmem:[#allocation2 + $0x28] sm:$0xff] %v495_v48  ;;  %v896_v48 = vld [vmem:[#allocation9 + $0xf0] sm:$0xff]  ;;  %v1034_v17 = vld [vmem:[#allocation9 + $0x268] sm:$0xff] }
 0x10f   :  { %v468_v54 = vpop.f32.mrf.mxu1 }
 0x110   :  { %v487_v35 = vadd.f32 %v468_v54, %v340_v36  ;;  %v889_v36 = vld [vmem:[#allocation9 + $0xb8] sm:$0xff] }
 0x111   :  { %v578_v39 = vld [vmem:[#allocation3 + $0x1] sm:$0xff] }
 0x112   :  { %v731_v41 = vld [vmem:[#allocation3 + $0x2] sm:$0xff]  ;;  %v496_v43 = vmax.f32 %v486_v53, %v487_v35  ;;  %631 = vmatmul.f32.vlgmr.msra.gmra.mxu2 %v578_v39  ;;  %660 = vmatmul.f32.vlgmr.msra.gmra.mxu3 %v578_v39  ;;  %v887_v35 = vld [vmem:[#allocation9 + $0xa8] sm:$0xff] }
 0x113   :  { %v511_v46 = vld [vmem:[#allocation2 + $0x20] ss:$2 sm:$0xff]  ;;  %v519_v5 = vld [vmem:[#allocation2 + $0x21] ss:$2 sm:$0xff]  ;;  %784 = vmatmul.f32.vlgmr.msra.gmra.mxu0 %v731_v41  ;;  %813 = vmatmul.f32.vlgmr.msrb.gmra.mxu1 %v731_v41 }
 0x114   :  { %504 = vst [vmem:[#allocation2 + $0x30] sm:$0xff] %v496_v43  ;;  %v524_v49 = vmax.f32 %v511_v46, %v519_v5  ;;  %898 = vmatpush.msra.mxu2 %v897_v27  ;;  %v888_v53 = vld [vmem:[#allocation9 + $0xb0] sm:$0xff]  ;;  %v878_v39 = vld [vmem:[#allocation9 + $0x78] sm:$0xff] }
 0x115   :  { %v956_v41 = vld [vmem:[#allocation9 + $0x178] sm:$0xff]  ;;  %918 = vmatpush.msra.mxu3 %v878_v39  ;;  %v955_v46 = vld [vmem:[#allocation9 + $0x170] sm:$0xff]  ;;  %v1030_v39 = vld [vmem:[#allocation9 + $0x248] sm:$0xff] }
 0x116   :  { %v532_v3 = vadd.f32 %v1712_v40, %v524_v49  ;;  %899 = vmatpush.msra.mxu2 %v896_v48  ;;  %957 = vmatpush.msrb.mxu0 %v956_v41  ;;  %v885_v43 = vld [vmem:[#allocation9 + $0x98] sm:$0xff]  ;;  %v995_v5 = vld [vmem:[#allocation9 + $0x1f0] sm:$0xff]  ;;  %v876_v49 = vld [vmem:[#allocation9 + $0x68] sm:$0xff] }
 0x117   :  { %v471_v4 = vpop.f32.mrf.mxu1  ;;  %919 = vmatpush.msra.mxu3 %v877_v58  ;;  %998 = vmatpush.msra.mxu1 %v995_v5  ;;  %v869_v48 = vld [vmem:[#allocation9 + $0x30] sm:$0xff]  ;;  %v867_v41 = vld [vmem:[#allocation9 + $0x20] sm:$0xff] }
 0x118   :  { %v489_v7 = vadd.f32 %v471_v4, %v343_v2  ;;  %v536_v8 = vmax.f32 %v532_v3, 0.0  ;;  %900 = vmatpush.msra.mxu2 %v895_v1  ;;  %958 = vmatpush.msrb.mxu0 %v955_v46  ;;  %v953_v2 = vld [vmem:[#allocation9 + $0x160] sm:$0xff]  ;;  %v947_v1 = vld [vmem:[#allocation9 + $0x130] sm:$0xff] }
 0x119   :  { %920 = vmatpush.msra.mxu3 %v876_v49  ;;  %999 = vmatpush.msra.mxu1 %v994_v60  ;;  %v993_v3 = vld [vmem:[#allocation9 + $0x1e0] sm:$0xff]  ;;  %v984_v49 = vld [vmem:[#allocation9 + $0x198] sm:$0xff]  ;;  %v865_v60 = vld [vmem:[#allocation9 + $0x10] sm:$0xff] }
 0x11a   :  { %v497_v11 = vmax.f32 %v488_v55, %v489_v7  ;;  %540 = vst [vmem:[#allocation3 + $0x10] sm:$0xff] %v536_v8  ;;  %959 = vmatpush.msrb.mxu0 %v954_v50  ;;  %v882_v4 = vld [vmem:[#allocation9 + $0x80] sm:$0xff]  ;;  %v992_v55 = vld [vmem:[#allocation9 + $0x1d8] sm:$0xff] }
 0x11b   :  { %921 = vmatpush.msra.mxu3 %v875_v62  ;;  %1000 = vmatpush.msra.mxu1 %v993_v3  ;;  %v985_v46 = vld [vmem:[#allocation9 + $0x1a0] sm:$0xff]  ;;  %v1028_v50 = vld [vmem:[#allocation9 + $0x238] sm:$0xff]  ;;  %v983_v3 = vld [vmem:[#allocation9 + $0x190] sm:$0xff] }
 0x11c   :  { %505 = vst [vmem:[#allocation2 + $0x38] sm:$0x3f] %v497_v11  ;;  %960 = vmatpush.msrb.mxu0 %v953_v2  ;;  %v1029_v5 = vld [vmem:[#allocation9 + $0x240] sm:$0xff] }
 0x11d   :  { %922 = vmatpush.msra.mxu3 %v874_v56  ;;  %1001 = vmatpush.msra.mxu1 %v992_v55  ;;  %v864_v55 = vld [vmem:[#allocation9 + $0x8] sm:$0xff] }
 0x11e   :  { %961 = vmatpush.msrb.mxu0 %v952_v6 }
 0x11f   :  { %923 = vmatpush.msra.mxu3 %v873_v59  ;;  %1002 = vmatpush.msra.mxu1 %v991_v12  ;;  %v863_v59 = vld [vmem:[#allocation9] sm:$0xff] }
 0x120   :  { %962 = vmatpush.msrb.mxu0 %v951_v18  ;;  %v941_v18 = vld [vmem:[#allocation9 + $0x100] sm:$0xff] }
 0x121   :  { %v579_v13 = vld [vmem:[#allocation3 + $0x9] sm:$0xff]  ;;  %1003 = vmatpush.msra.mxu1 %v990_v16 }
 0x122   :  { %v732_v14 = vld [vmem:[#allocation3 + $0xa] sm:$0xff]  ;;  %634 = vmatmul.f32.gmra.mxu2 %v579_v13  ;;  %663 = vmatmul.f32.gmra.mxu3 %v579_v13  ;;  %v1035_v13 = vld [vmem:[#allocation9 + $0x270] sm:$0xff] }
 0x123   :  { %v513_v63 = vld [vmem:[#allocation2 + $0x30] ss:$2 sm:$0xff]  ;;  %v521_v57 = vld [vmem:[#allocation2 + $0x31] ss:$2 sm:$0xff]  ;;  %787 = vmatmul.f32.gmra.mxu0 %v732_v14  ;;  %816 = vmatmul.f32.gmra.mxu1 %v732_v14  ;;  %v1024_v16 = vld [vmem:[#allocation9 + $0x218] sm:$0xff] }
 0x124   :  { %v525_v19 = vmax.f32 %v513_v63, %v521_v57  ;;  %v872_v14 = vld [vmem:[#allocation9 + $0x48] sm:$0xff]  ;;  %963 = vmatpush.msrb.mxu0 %v950_v15 }
 0x125   :  { %924 = vmatpush.msra.mxu3 %v872_v14 }
 0x126   :  { %v533_v20 = vadd.f32 %v1712_v40, %v525_v19  ;;  %v871_v19 = vld [vmem:[#allocation9 + $0x40] sm:$0xff] }
 0x127   :  { %925 = vmatpush.msra.mxu3 %v871_v19 }
 0x128   :  { %v537_v21 = vmax.f32 %v533_v20, 0.0  ;;  %v949_v20 = vld [vmem:[#allocation9 + $0x140] sm:$0xff] }
 0x129   :  { %964 = vmatpush.msrb.mxu0 %v949_v20 }
 0x12a   :  { %541 = vst [vmem:[#allocation3 + $0x18] sm:$0xff] %v537_v21  ;;  %v989_v21 = vld [vmem:[#allocation9 + $0x1c0] sm:$0xff] }
 0x12b   :  { %1004 = vmatpush.msra.mxu1 %v989_v21 }
 0x131   :  { %v580_v22 = vld [vmem:[#allocation3 + $0x11] sm:$0xff]  ;;  %v581_v24 = vld [vmem:[#allocation3 + $0x19] sm:$0x3f] }
 0x132   :  { %v733_v23 = vld [vmem:[#allocation3 + $0x12] sm:$0xff]  ;;  %637 = vmatmul.f32.gmra.mxu2 %v580_v22  ;;  %666 = vmatmul.f32.gmra.mxu3 %v580_v22  ;;  %v734_v26 = vld [vmem:[#allocation3 + $0x1a] sm:$0x3f] }
 0x133   :  { %790 = vmatmul.f32.gmra.mxu0 %v733_v23  ;;  %819 = vmatmul.f32.gmra.mxu1 %v733_v23  ;;  %v545_v40 = vld [vmem:[#allocation3 + $0x18] sm:$0x3f]  ;;  %v1033_v23 = vld [vmem:[#allocation9 + $0x260] sm:$0xff] }
 0x13a   :  { %640 = vmatmul.f32.gmra.mxu2 %v581_v24  ;;  %669 = vmatmul.f32.gmra.mxu3 %v581_v24  ;;  %v870_v24 = vld [vmem:[#allocation9 + $0x38] sm:$0xff] }
 0x13b   :  { %793 = vmatmul.f32.gmra.mxu0 %v734_v26  ;;  %822 = vmatmul.f32.gmra.mxu1 %v734_v26  ;;  %v948_v26 = vld [vmem:[#allocation9 + $0x138] sm:$0xff] }
 0x13c   :  { %926 = vmatpush.msra.mxu3 %v870_v24  ;;  %965 = vmatpush.msrb.mxu0 %v948_v26 }
 0x13e   :  { %927 = vmatpush.msra.mxu3 %v869_v48  ;;  %966 = vmatpush.msrb.mxu0 %v947_v1  ;;  %v1079_v1 = vld [vmem:[%s1832_s7 + $0x78] sm:$0xff] }
 0x142   :  { %689 = vmatmul.f32.vlgmr.msrb.gmra.mxu2 %v1717_v0  ;;  %718 = vmatmul.f32.vlgmr.msrb.gmra.mxu3 %v1717_v0  ;;  %v894_v0 = vld [vmem:[#allocation9 + $0xe0] sm:$0xff] }
 0x143   :  { %901 = vmatpush.msra.mxu2 %v894_v0 }
 0x145   :  { %902 = vmatpush.msra.mxu2 %v893_v30 }
 0x147   :  { %903 = vmatpush.msra.mxu2 %v892_v32  ;;  %v987_v32 = vld [vmem:[#allocation9 + $0x1b0] sm:$0xff] }
 0x149   :  { %904 = vmatpush.msra.mxu2 %v891_v33  ;;  %v1031_v33 = vld [vmem:[#allocation9 + $0x250] sm:$0xff] }
 0x14a   :  { %692 = vmatmul.f32.gmra.mxu2 %v1725_v25  ;;  %721 = vmatmul.f32.gmra.mxu3 %v1725_v25 }
 0x14b   :  { %905 = vmatpush.msra.mxu2 %v890_v34  ;;  %v868_v34 = vld [vmem:[#allocation9 + $0x28] sm:$0xff] }
 0x14c   :  { %928 = vmatpush.msra.mxu3 %v868_v34 }
 0x14d   :  { %906 = vmatpush.msra.mxu2 %v889_v36 }
 0x14e   :  { %929 = vmatpush.msra.mxu3 %v867_v41 }
 0x14f   :  { %907 = vmatpush.msra.mxu2 %v888_v53 }
 0x151   :  { %908 = vmatpush.msra.mxu2 %v887_v35  ;;  %v946_v35 = vld [vmem:[#allocation9 + $0x128] sm:$0xff] }
 0x152   :  { %695 = vmatmul.f32.gmra.mxu2 %v536_v8  ;;  %724 = vmatmul.f32.gmra.mxu3 %v536_v8 }
 0x153   :  { %909 = vmatpush.msra.mxu2 %v886_v38  ;;  %v986_v38 = vld [vmem:[#allocation9 + $0x1a8] sm:$0xff]  ;;  %967 = vmatpush.msrb.mxu0 %v946_v35 }
 0x155   :  { %910 = vmatpush.msra.mxu2 %v885_v43  ;;  %968 = vmatpush.msrb.mxu0 %v945_v42 }
 0x157   :  { %911 = vmatpush.msra.mxu2 %v884_v47  ;;  %v944_v47 = vld [vmem:[#allocation9 + $0x118] sm:$0xff] }
 0x158   :  { %969 = vmatpush.msrb.mxu0 %v944_v47  ;;  %v1069_v47 = vld [vmem:[%s1832_s7 + $0x28] sm:$0xff] }
 0x159   :  { %912 = vmatpush.msra.mxu2 %v883_v61  ;;  %v943_v61 = vld [vmem:[#allocation9 + $0x110] sm:$0xff] }
 0x15a   :  { %698 = vmatmul.f32.gmra.mxu2 %v545_v40  ;;  %727 = vmatmul.f32.gmra.mxu3 %v545_v40  ;;  %v988_v40 = vld [vmem:[#allocation9 + $0x1b8] sm:$0xff] }
 0x15b   :  { %913 = vmatpush.msra.mxu2 %v882_v4  ;;  %1005 = vmatpush.msra.mxu1 %v988_v40  ;;  %v1027_v4 = vld [vmem:[#allocation9 + $0x230] sm:$0xff] }
 0x15c   :  { %970 = vmatpush.msrb.mxu0 %v943_v61  ;;  %v1064_v61 = vld [vmem:[%s1832_s7] sm:$0xff] }
 0x15d   :  { %1037 = vmatpush.msrb.mxu2 %v1036_v9  ;;  %1006 = vmatpush.msra.mxu1 %v987_v32 }
 0x15f   :  { %1038 = vmatpush.msrb.mxu2 %v1035_v13  ;;  %1007 = vmatpush.msra.mxu1 %v986_v38  ;;  %v1025_v13 = vld [vmem:[#allocation9 + $0x220] sm:$0xff] }
 0x161   :  { %1039 = vmatpush.msrb.mxu2 %v1034_v17  ;;  %1008 = vmatpush.msra.mxu1 %v985_v46  ;;  %v1072_v46 = vld [vmem:[%s1832_s7 + $0x40] sm:$0xff] }
 0x163   :  { %1040 = vmatpush.msrb.mxu2 %v1033_v23  ;;  %1009 = vmatpush.msra.mxu1 %v984_v49  ;;  %v1022_v23 = vld [vmem:[#allocation9 + $0x208] sm:$0xff] }
 0x164   :  { %v1067_v49 = vld [vmem:[%s1832_s7 + $0x18] sm:$0xff] }
 0x165   :  { %1010 = vmatpush.msra.mxu1 %v983_v3  ;;  %v1118_v3 = vld [vmem:[#allocation11 + $0x68] sm:$0xff] }
 0x190   :  { %v785_v7 = vpop.f32.mrf.mxu0  ;;  %v814_v8 = vpop.f32.mrf.mxu1 }
 0x195   :  { %v1738_v28 = vpop.f32.mrf.mxu2  ;;  %v1740_v29 = vpop.f32.mrf.mxu3 }
 0x1a0   :  { %v788_v27 = vpop.f32.mrf.mxu0 }
 0x1a5   :  { %v1742_v31 = vpop.f32.mrf.mxu2  ;;  %v1744_v25 = vpop.f32.mrf.mxu3 }
 0x1b0   :  { %v791_v62 = vpop.f32.mrf.mxu0 }
 0x1b5   :  { %v1746_v37 = vpop.f32.mrf.mxu2  ;;  %v1748_v54 = vpop.f32.mrf.mxu3 }
 0x1b8   :  { %v794_v24 = vpop.f32.mrf.mxu0 }
 0x1bd   :  { %v1750_v44 = vpop.f32.mrf.mxu2  ;;  %v1752_v45 = vpop.f32.mrf.mxu3 }
 0x1c5   :  { %v690_v10 = vpop.f32.mrf.mxu2  ;;  %v719_v11 = vpop.f32.mrf.mxu3 }
 0x1c6   :  { %v691_v51 = vadd.f32 %v690_v10, %v1738_v28  ;;  %v720_v52 = vadd.f32 %v719_v11, %v1740_v29  ;;  %v817_v28 = vpop.f32.mrf.mxu1  ;;  %v1032_v29 = vld [vmem:[#allocation9 + $0x258] sm:$0xff]  ;;  %v982_v10 = vld [vmem:[#allocation9 + $0x188] sm:$0xff] }
 0x1c7   :  { %1041 = vmatpush.msrb.mxu2 %v1032_v29  ;;  %v1026_v11 = vld [vmem:[#allocation9 + $0x228] sm:$0xff]  ;;  %1011 = vmatpush.msra.mxu1 %v982_v10  ;;  %v1021_v29 = vld [vmem:[#allocation9 + $0x200] sm:$0xff] }
 0x1c8   :  { %v826_v63 = vadd.f32 %v785_v7, %v691_v51  ;;  %v827_v57 = vadd.f32 %v814_v8, %v720_v52  ;;  %v942_v7 = vld [vmem:[#allocation9 + $0x108] sm:$0xff]  ;;  %v981_v52 = vld [vmem:[#allocation9 + $0x180] sm:$0xff] }
 0x1c9   :  { %1042 = vmatpush.msrb.mxu2 %v1031_v33  ;;  %971 = vmatpush.msrb.mxu0 %v942_v7  ;;  %v1113_v7 = vld [vmem:[#allocation11 + $0x40] sm:$0xff] }
 0x1ca   :  { %v834_v22 = vmax.f32 %v826_v63, %v827_v57  ;;  %1012 = vmatpush.msra.mxu1 %v981_v52  ;;  %v1023_v57 = vld [vmem:[#allocation9 + $0x210] sm:$0xff]  ;;  %v1109_v52 = vld [vmem:[#allocation11 + $0x20] sm:$0xff] }
 0x1cb   :  { %1043 = vmatpush.msrb.mxu2 %v1030_v39  ;;  %972 = vmatpush.msrb.mxu0 %v941_v18  ;;  %v1110_v18 = vld [vmem:[#allocation11 + $0x28] sm:$0xff] }
 0x1cc   :  { %838 = vst [vmem:[#allocation4] sm:$0xff] %v834_v22 }
 0x1cd   :  { %v693_v0 = vpop.f32.mrf.mxu2  ;;  %v722_v30 = vpop.f32.mrf.mxu3  ;;  %1044 = vmatpush.msrb.mxu2 %v1029_v5  ;;  %v1071_v5 = vld [vmem:[%s1832_s7 + $0x38] sm:$0xff] }
 0x1ce   :  { %v694_v36 = vadd.f32 %v693_v0, %v1742_v31  ;;  %v723_v53 = vadd.f32 %v722_v30, %v1744_v25  ;;  %v866_v31 = vld [vmem:[#allocation9 + $0x18] sm:$0xff]  ;;  %v820_v2 = vpop.f32.mrf.mxu1  ;;  %v1076_v0 = vld [vmem:[%s1832_s7 + $0x60] sm:$0xff]  ;;  %v1075_v30 = vld [vmem:[%s1832_s7 + $0x58] sm:$0xff] }
 0x1cf   :  { %930 = vmatpush.msra.mxu3 %v866_v31  ;;  %1045 = vmatpush.msrb.mxu2 %v1028_v50  ;;  %v1070_v31 = vld [vmem:[%s1832_s7 + $0x30] sm:$0xff] }
 0x1d0   :  { %v828_v43 = vadd.f32 %v788_v27, %v694_v36  ;;  %v829_v58 = vadd.f32 %v817_v28, %v723_v53  ;;  %v1066_v50 = vld [vmem:[%s1832_s7 + $0x10] sm:$0xff] }
 0x1d1   :  { %931 = vmatpush.msra.mxu3 %v865_v60  ;;  %1046 = vmatpush.msrb.mxu2 %v1027_v4  ;;  %v1065_v60 = vld [vmem:[%s1832_s7 + $0x8] sm:$0xff]  ;;  %v1117_v4 = vld [vmem:[#allocation11 + $0x60] sm:$0xff] }
 0x1d2   :  { %v835_v25 = vmax.f32 %v828_v43, %v829_v58  ;;  %v1074_v43 = vld [vmem:[%s1832_s7 + $0x50] sm:$0xff]  ;;  %v1073_v58 = vld [vmem:[%s1832_s7 + $0x48] sm:$0xff] }
 0x1d3   :  { %932 = vmatpush.msra.mxu3 %v864_v55  ;;  %1047 = vmatpush.msrb.mxu2 %v1026_v11  ;;  %v1114_v55 = vld [vmem:[#allocation11 + $0x48] sm:$0xff] }
 0x1d4   :  { %839 = vst [vmem:[#allocation4 + $0x8] sm:$0xff] %v835_v25  ;;  %v1068_v25 = vld [vmem:[%s1832_s7 + $0x20] sm:$0xff] }
 0x1d5   :  { %v696_v56 = vpop.f32.mrf.mxu2  ;;  %v725_v6 = vpop.f32.mrf.mxu3  ;;  %933 = vmatpush.msra.mxu3 %v863_v59  ;;  %1048 = vmatpush.msrb.mxu2 %v1025_v13  ;;  %v1108_v13 = vld [vmem:[#allocation11 + $0x18] sm:$0xff] }
 0x1d6   :  { %v697_v8 = vadd.f32 %v696_v56, %v1746_v37  ;;  %v726_v9 = vadd.f32 %v725_v6, %v1748_v54  ;;  %v1256_v37 = vld [vmem:[%s1829_s4] ss:$0 sm:$0xff]  ;;  %v823_v26 = vpop.f32.mrf.mxu1  ;;  %v1116_v56 = vld [vmem:[#allocation11 + $0x58] sm:$0xff] }
 0x1d7   :  { %1049 = vmatpush.msrb.mxu2 %v1024_v16  ;;  %1084 = vmatpush.msrb.mxu3 %v1079_v1  ;;  %v1115_v6 = vld [vmem:[#allocation11 + $0x50] sm:$0xff] }
 0x1d8   :  { %v830_v12 = vadd.f32 %v791_v62, %v697_v8  ;;  %v831_v51 = vadd.f32 %v820_v2, %v726_v9  ;;  %v1120_v62 = vld [vmem:[#allocation11 + $0x78] sm:$0xff]  ;;  %v1119_v2 = vld [vmem:[#allocation11 + $0x70] sm:$0xff] }
 0x1d9   :  { %1050 = vmatpush.msrb.mxu2 %v1023_v57  ;;  %1125 = vmatpush.msra.mxu0 %v1120_v62  ;;  %v1112_v8 = vld [vmem:[#allocation11 + $0x38] sm:$0xff]  ;;  %v1111_v9 = vld [vmem:[#allocation11 + $0x30] sm:$0xff] }
 0x1da   :  { %v836_v14 = vmax.f32 %v830_v12, %v831_v51 }
 0x1db   :  { %v843_v54 = vld [vmem:[#allocation4] ss:$2 sm:$0xff]  ;;  %v847_v15 = vld [vmem:[#allocation4 + $0x1] ss:$2 sm:$0xff]  ;;  %1051 = vmatpush.msrb.mxu2 %v1022_v23  ;;  %1126 = vmatpush.msra.mxu0 %v1119_v2 }
 0x1dc   :  { %v850_v63 = vmax.f32 %v843_v54, %v847_v15  ;;  %840 = vst [vmem:[#allocation4 + $0x10] sm:$0xff] %v836_v14  ;;  %v1257_v54 = vld [vmem:[%s1831_s6] ss:$0 sm:$0xff] }
 0x1dd   :  { %v699_v17 = vpop.f32.mrf.mxu2  ;;  %v728_v19 = vpop.f32.mrf.mxu3  ;;  %1052 = vmatpush.msrb.mxu2 %v1021_v29  ;;  %1127 = vmatpush.msra.mxu0 %v1118_v3 }
 0x1de   :  { %v700_v20 = vadd.f32 %v699_v17, %v1750_v44  ;;  %v729_v21 = vadd.f32 %v728_v19, %v1752_v45  ;;  %v856_v22 = vadd.f32 %v1256_v37, %v850_v63  ;;  %v1078_v44 = vld [vmem:[%s1832_s7 + $0x70] sm:$0xff]  ;;  %v1077_v45 = vld [vmem:[%s1832_s7 + $0x68] sm:$0xff]  ;;  %v1107_v17 = vld [vmem:[#allocation11 + $0x10] sm:$0xff] }
 0x1df   :  { %1085 = vmatpush.msrb.mxu3 %v1078_v44  ;;  %1128 = vmatpush.msra.mxu0 %v1117_v4  ;;  %v1106_v19 = vld [vmem:[#allocation11 + $0x8] sm:$0xff] }
 0x1e0   :  { %v832_v40 = vadd.f32 %v794_v24, %v700_v20  ;;  %v833_v27 = vadd.f32 %v823_v26, %v729_v21  ;;  %v858_v28 = vmax.f32 %v856_v22, 0.0  ;;  %v1105_v20 = vld [vmem:[#allocation11] sm:$0xff]  ;;  %v1258_v21 = vld [vmem:[%s1833_s8] ss:$0 sm:$0xff] }
 0x1e1   :  { %1086 = vmatpush.msrb.mxu3 %v1077_v45  ;;  %1129 = vmatpush.msra.mxu0 %v1116_v56  ;;  %v1259_v26 = vld [vmem:[%s1835_s10] ss:$0 sm:$0xff] }
 0x1e2   :  { %v837_v48 = vmax.f32 %v832_v40, %v833_v27  ;;  %860 = vst [vmem:[#allocation5] sm:$0xff] %v858_v28 }
 0x1e3   :  { %1087 = vmatpush.msrb.mxu3 %v1076_v0  ;;  %1130 = vmatpush.msra.mxu0 %v1115_v6 }
 0x1e4   :  { %841 = vst [vmem:[#allocation4 + $0x18] sm:$0x3f] %v837_v48 }
 0x1e5   :  { %1088 = vmatpush.msrb.mxu3 %v1075_v30  ;;  %1131 = vmatpush.msra.mxu0 %v1114_v55 }
 0x1e7   :  { %1089 = vmatpush.msrb.mxu3 %v1074_v43  ;;  %1132 = vmatpush.msra.mxu0 %v1113_v7 }
 0x1e9   :  { %1090 = vmatpush.msrb.mxu3 %v1073_v58  ;;  %1133 = vmatpush.msra.mxu0 %v1112_v8 }
 0x1eb   :  { %v845_v32 = vld [vmem:[#allocation4 + $0x10] ss:$2 sm:$0xff]  ;;  %v849_v33 = vld [vmem:[#allocation4 + $0x11] ss:$2 sm:$0xff]  ;;  %1091 = vmatpush.msrb.mxu3 %v1072_v46  ;;  %1134 = vmatpush.msra.mxu0 %v1111_v9 }
 0x1ec   :  { %v851_v34 = vmax.f32 %v845_v32, %v849_v33 }
 0x1ed   :  { %1092 = vmatpush.msrb.mxu3 %v1071_v5  ;;  %1135 = vmatpush.msra.mxu0 %v1110_v18 }
 0x1ee   :  { %v857_v36 = vadd.f32 %v1256_v37, %v851_v34 }
 0x1ef   :  { %1093 = vmatpush.msrb.mxu3 %v1070_v31  ;;  %1136 = vmatpush.msra.mxu0 %v1109_v52 }
 0x1f0   :  { %v859_v53 = vmax.f32 %v857_v36, 0.0 }
 0x1f1   :  { %1094 = vmatpush.msrb.mxu3 %v1069_v47  ;;  %1137 = vmatpush.msra.mxu0 %v1108_v13 }
 0x1f2   :  { %861 = vst [vmem:[#allocation5 + $0x8] sm:$0xff] %v859_v53 }
 0x1f3   :  { %1095 = vmatpush.msrb.mxu3 %v1068_v25  ;;  %1138 = vmatpush.msra.mxu0 %v1107_v17 }
 0x1f5   :  { %1096 = vmatpush.msrb.mxu3 %v1067_v49  ;;  %1139 = vmatpush.msra.mxu0 %v1106_v19 }
 0x1f7   :  { %1097 = vmatpush.msrb.mxu3 %v1066_v50  ;;  %1140 = vmatpush.msra.mxu0 %v1105_v20 }
 0x1f9   :  { %v880_v35 = vld [vmem:[#allocation5 + $0x1] ss:$8 sm:$0x3]  ;;  %v862_v38 = vld [vmem:[#allocation5] ss:$8 sm:$0x3]  ;;  %1098 = vmatpush.msrb.mxu3 %v1065_v60 }
 0x1fa   :  { %914 = vmatmul.f32.vlgmr.msra.gmra.mxu2 %v880_v35  ;;  %934 = vmatmul.f32.vlgmr.msra.gmra.mxu3 %v862_v38  ;;  %v939_v39 = vld [vmem:[#allocation5 + $0x2] ss:$8 sm:$0x3]  ;;  %v979_v41 = vld [vmem:[#allocation5 + $0x3] ss:$8 sm:$0x3] }
 0x1fb   :  { %973 = vmatmul.f32.vlgmr.msrb.gmra.mxu0 %v939_v39  ;;  %1013 = vmatmul.f32.vlgmr.msra.gmra.mxu1 %v979_v41  ;;  %v1019_v42 = vld [vmem:[#allocation5 + $0x4] ss:$8 sm:$0x3] }
 0x1fc   :  { %1099 = vmatpush.msrb.mxu3 %v1064_v61 }
 0x202   :  { %1053 = vmatmul.f32.vlgmr.msrb.gmra.mxu2 %v1019_v42 }
 0x278   :  { %v974_v12 = vpop.f32.mrf.mxu0  ;;  %v1014_v14 = vpop.f32.mrf.mxu1 }
 0x27d   :  { %v915_v10 = vpop.f32.mrf.mxu2  ;;  %v935_v11 = vpop.f32.mrf.mxu3 }
 0x27e   :  { %v936_v59 = vadd.f32 %v935_v11, %v915_v10 }
 0x280   :  { %v977_v51 = vadd.f32 %v974_v12, %v936_v59 }
 0x282   :  { %v1017_v37 = vadd.f32 %v1014_v14, %v977_v51 }
 0x285   :  { %v1054_v15 = vpop.f32.mrf.mxu2 }
 0x286   :  { %v1057_v16 = vadd.f32 %v1054_v15, %v1017_v37 }
 0x288   :  { %v1062_v63 = vadd.f32 %v1257_v54, %v1057_v16 }
 0x28a   :  { %v1063_v57 = vmax.f32 %v1062_v63, 0.0 }
 0x28c   :  { %1100 = vmatmul.f32.vlgmr.msrb.gmra.mxu3 %v1063_v57 }
 0x30f   :  { %v1101_v22 = vpop.f32.mrf.mxu3 }
 0x310   :  { %v1102_v23 = vadd.f32 %v1258_v21, %v1101_v22 }
 0x312   :  { %v1104_v24 = vmax.f32 %v1102_v23, 0.0 }
 0x314   :  { %1141 = vmatmul.f32.vlgmr.msra.gmra.mxu0 %v1104_v24 }
 0x391   :  { %v1142_v40 = vpop.f32.mrf.mxu0 }
 0x392   :  { %v1143_v27 = vadd.f32 %v1259_v26, %v1142_v40 }
 0x394   :  { %1145 = vst [vmem:[#allocation12] sm:$0x3] %v1143_v27 }
 0x395   :  { %1156 = dma.vmem_to_hbm [thread:$0]  %s1152_s12, 32, %s1154_s15, [#allocation8]  }
 0x396   :  { %1360 = dma.done.wait [#allocation8], 32  }
 0x397   :  { %1361 = vsyncadd [#allocation8], 4294967264 }
 0x398   :  { %1161 = vsyncpa [#allocation7], 1 }
 0x399   :  { %1162 = vsyncpa [#allocation10], 1 }
 0x39a   :  { %1163 = vsyncpa [#allocation8], 1 }

</bundles_post_ra>
